<compile_context>
chip_gen: v6e
topology: v6e:2x2x1
jax: 0.10.0
libtpu: 0.0.40
codegen_flags: <defaults>
</compile_context>

<pallas_src>
import functools

import jax
import jax.numpy as jnp
from jax.experimental import pallas as pl
from jax.experimental.pallas import tpu as pltpu


_HALO = 128  # zero halo (lanes) on each side of the flattened spatial axis


def _stage_into_halo(s_ref, middle, m):
    """Write `middle` (C, m) into the halo-padded scratch (C, HALO+m+HALO),
    zeroing only the halo strips (all stores lane-aligned)."""
    c = s_ref.shape[0]
    zeros_halo = jnp.zeros((c, _HALO), jnp.float32)
    s_ref[:, :_HALO] = zeros_halo
    s_ref[:, _HALO + m:] = zeros_halo
    s_ref[:, _HALO:_HALO + m] = middle


# ----------------------------------------------------------------------------
# Fused kernel: N x (3x3 SAME conv + ReLU), channels-first flat layout
# ----------------------------------------------------------------------------
def _make_fused_conv_relu_kernel(num_blocks, W, M):
    """Kernel ref order:
         x        : (C0, M)                 flat raw input (no external pad)
         masks    : (9, 1, M)               per-tap validity (0/1 f32)
         w_i, b_i : (9, C_out, C_in), (C_out, 1)   for each block i
         o        : (C_last, M)             lane-dense output
         scratch_i: (C_in_i, HALO+M+HALO)   halo-padded activation stages
                                            (one per block input, i = 0..n-1)
    """

    def kernel(*refs):
        x_ref, masks_ref = refs[0], refs[1]
        wb_refs = refs[2:2 + 2 * num_blocks]
        o_ref = refs[2 + 2 * num_blocks]
        scratch_refs = refs[3 + 2 * num_blocks:]

        # Stage the raw input into its halo-padded VMEM buffer.
        _stage_into_halo(scratch_refs[0], x_ref[...].astype(jnp.float32), M)
        src_ref = scratch_refs[0]

        for blk in range(num_blocks):
            w_ref = wb_refs[2 * blk]        # (9, C_out, C_in)
            b_ref = wb_refs[2 * blk + 1]    # (C_out, 1)
            c_out = w_ref.shape[1]

            src = src_ref[...]              # (C_in, HALO + M + HALO), in VMEM
            acc = jnp.zeros((c_out, M), jnp.float32)
            for k in range(9):
                kh, kw = divmod(k, 3)
                off = (kh - 1) * W + (kw - 1)
                # Shifted flat view of the activation; halo keeps the static
                # slice in-bounds, masks zero the out-of-image taps.
                piece = src[:, _HALO + off:_HALO + off + M]   # (C_in, M)
                if not (kh == 1 and kw == 1):
                    piece = piece * masks_ref[k]              # (1, M) bcast
                acc = acc + jnp.dot(w_ref[k], piece,
                                    preferred_element_type=jnp.float32)

            cur = jnp.maximum(acc + b_ref[...], 0.0)          # (C_out, M) f32

            if blk == num_blocks - 1:
                o_ref[...] = cur.astype(o_ref.dtype)
            else:
                # Intermediate stays resident in VMEM (halo-padded) for the
                # next block — never round-trips through HBM.
                _stage_into_halo(scratch_refs[blk + 1], cur, M)
                src_ref = scratch_refs[blk + 1]

    return kernel


def _tap_masks(B, H, W):
    """(9, 1, B*H*W) 0/1 masks: is tap (kh,kw) inside the image at pixel p."""
    M = B * H * W
    hw = jnp.arange(M, dtype=jnp.int32) % (H * W)
    h = hw // W
    w = hw % W
    rows = []
    for kh in range(3):
        for kw in range(3):
            dh, dw = kh - 1, kw - 1
            valid = ((h + dh >= 0) & (h + dh < H) &
                     (w + dw >= 0) & (w + dw < W))
            rows.append(valid.astype(jnp.float32))
    return jnp.stack(rows, axis=0).reshape(9, 1, M)


# ----------------------------------------------------------------------------
# MultiLayer forward: all blocks fused into one pallas_call
# ----------------------------------------------------------------------------
def multilayer_forward(x_nchw, params):
    """x: (B, C, H, W) NCHW like PyTorch. Returns NCHW."""
    B, C0, H, W = x_nchw.shape
    M = B * H * W
    n_blocks = len(params)
    c_last = params[-1][0].shape[0]

    # Channels-first flat layout: (C, B*H*W); lane dim = 512 (lane-dense).
    x_flat = jnp.transpose(x_nchw, (1, 0, 2, 3)).reshape(C0, M)

    masks = _tap_masks(B, H, W)

    flat_wb = []
    # One halo-padded VMEM stage per block input (input + intermediates).
    scratch_shapes = [pltpu.VMEM((C0, M + 2 * _HALO), jnp.float32)]
    for i, (wgt, bias) in enumerate(params):
        c_out, c_in = wgt.shape[0], wgt.shape[1]
        # (C_out, C_in, 3, 3) -> (3, 3, C_out, C_in) -> (9, C_out, C_in)
        w_taps = jnp.transpose(wgt, (2, 3, 0, 1)).reshape(9, c_out, c_in)
        flat_wb += [w_taps.astype(jnp.float32),
                    bias.reshape(c_out, 1).astype(jnp.float32)]
        if i != n_blocks - 1:
            scratch_shapes.append(
                pltpu.VMEM((c_out, M + 2 * _HALO), jnp.float32))

    kernel = _make_fused_conv_relu_kernel(n_blocks, W, M)
    out_flat = pl.pallas_call(
        kernel,
        out_shape=jax.ShapeDtypeStruct((c_last, M), jnp.float32),
        scratch_shapes=scratch_shapes,
    )(x_flat, masks, *flat_wb)

    # (C_last, B*H*W) -> (B, C_last, H, W)
    return jnp.transpose(out_flat.reshape(c_last, B, H, W), (1, 0, 2, 3))


def init_params(key, channels=(4, 8, 8)):
    """Deterministic conv weights (C_out, C_in, 3, 3) + bias."""
    params = []
    for idx in range(len(channels) - 1):
        c_in, c_out = channels[idx], channels[idx + 1]
        k_w, k_b, key = jax.random.split(key, 3)
        fan_in = c_in * 9
        w = jax.random.normal(k_w, (c_out, c_in, 3, 3), jnp.float32)
        w = w * (2.0 / fan_in) ** 0.5
        b = jax.random.normal(k_b, (c_out,), jnp.float32) * 0.01
        params.append((w, b))
    return params


def _reference_forward(x_nchw, params):
    """Pure-JAX reference (lax conv) for a correctness check."""
    x = x_nchw
    for (w, b) in params:
        y = jax.lax.conv_general_dilated(
            x, w, window_strides=(1, 1), padding="SAME",
            dimension_numbers=("NCHW", "OIHW", "NCHW"))
        x = jnp.maximum(y + b.reshape(1, -1, 1, 1), 0.0)
    return x


if __name__ == "__main__":
    key = jax.random.PRNGKey(0)
    k_x, k_p = jax.random.split(key)

    # Small shapes consistent with the module: batch=2, channels=4, spatial=16.
    x = jax.random.normal(k_x, (2, 4, 16, 16), jnp.float32)
    params = init_params(k_p, channels=(4, 8, 8))

    fwd = jax.jit(functools.partial(multilayer_forward, params=params))
    out = fwd(x)
    jax.block_until_ready(out)

    ref = _reference_forward(x, params)
    assert out.shape == ref.shape == (2, 8, 16, 16)
    assert jnp.allclose(out, ref, atol=1e-4, rtol=1e-4), "mismatch vs reference"

    print("KERNEL_OK")
</pallas_src>

<mosaic_0001>
module attributes {stable_mosaic.version = 11 : i64} {
  func.func @kernel(%arg0: memref<4x512xf32, #tpu.memory_space<vmem>>, %arg1: memref<9x1x512xf32, #tpu.memory_space<vmem>>, %arg2: memref<9x8x4xf32, #tpu.memory_space<vmem>>, %arg3: memref<8x1xf32, #tpu.memory_space<vmem>>, %arg4: memref<9x8x8xf32, #tpu.memory_space<vmem>>, %arg5: memref<8x1xf32, #tpu.memory_space<vmem>>, %arg6: memref<8x512xf32, #tpu.memory_space<vmem>>, %arg7: memref<4x768xf32, #tpu.memory_space<vmem>>, %arg8: memref<8x768xf32, #tpu.memory_space<vmem>>) attributes {dimension_semantics = [], scalar_prefetch = 0 : i64, scratch_operands = 2 : i64, tpu.core_type = #tpu.core_type<tc>} {
    %c0 = arith.constant 0 : index
    %c0_0 = arith.constant 0 : index
    %0 = vector.load %arg0[%c0, %c0_0] : memref<4x512xf32, #tpu.memory_space<vmem>>, vector<4x512xf32>
    %cst = arith.constant 0.000000e+00 : f32
    %1 = vector.broadcast %cst : f32 to vector<4x128xf32>
    %c0_1 = arith.constant 0 : index
    %c0_2 = arith.constant 0 : index
    %2 = vector.load %arg7[%c0_1, %c0_2] : memref<4x768xf32, #tpu.memory_space<vmem>>, vector<4x128xf32>
    tpu.vector_store %arg7[%c0_1, %c0_2], %1 {strides = array<i32>} : memref<4x768xf32, #tpu.memory_space<vmem>>, vector<4x128xf32>,
    %c0_3 = arith.constant 0 : index
    %c640 = arith.constant 640 : index
    %3 = vector.load %arg7[%c0_3, %c640] : memref<4x768xf32, #tpu.memory_space<vmem>>, vector<4x128xf32>
    tpu.vector_store %arg7[%c0_3, %c640], %1 {strides = array<i32>} : memref<4x768xf32, #tpu.memory_space<vmem>>, vector<4x128xf32>,
    %c0_4 = arith.constant 0 : index
    %c128 = arith.constant 128 : index
    %4 = vector.load %arg7[%c0_4, %c128] : memref<4x768xf32, #tpu.memory_space<vmem>>, vector<4x512xf32>
    tpu.vector_store %arg7[%c0_4, %c128], %0 {strides = array<i32>} : memref<4x768xf32, #tpu.memory_space<vmem>>, vector<4x512xf32>,
    %c0_5 = arith.constant 0 : index
    %c0_6 = arith.constant 0 : index
    %5 = vector.load %arg7[%c0_5, %c0_6] : memref<4x768xf32, #tpu.memory_space<vmem>>, vector<4x768xf32>
    %cst_7 = arith.constant 0.000000e+00 : f32
    %6 = vector.broadcast %cst_7 : f32 to vector<8x512xf32>
    %7 = vector.extract_strided_slice %5 {offsets = [0, 111], sizes = [4, 512], strides = [1, 1]} : vector<4x768xf32> to vector<4x512xf32>
    %c0_8 = arith.constant 0 : index
    %c0_9 = arith.constant 0 : index
    %c0_10 = arith.constant 0 : index
    %8 = vector.load %arg1[%c0_8, %c0_9, %c0_10] : memref<9x1x512xf32, #tpu.memory_space<vmem>>, vector<1x1x512xf32>
    %9 = vector.shape_cast %8 : vector<1x1x512xf32> to vector<1x512xf32>
    %10 = vector.broadcast %9 : vector<1x512xf32> to vector<4x512xf32>
    %11 = arith.mulf %7, %10 : vector<4x512xf32>
    %c0_11 = arith.constant 0 : index
    %c0_12 = arith.constant 0 : index
    %c0_13 = arith.constant 0 : index
    %12 = vector.load %arg2[%c0_11, %c0_12, %c0_13] : memref<9x8x4xf32, #tpu.memory_space<vmem>>, vector<1x8x4xf32>
    %13 = vector.shape_cast %12 : vector<1x8x4xf32> to vector<8x4xf32>
    %cst_14 = arith.constant dense<0.000000e+00> : vector<8x512xf32>
    %14 = tpu.matmul %13, %11, %cst_14 {dimension_numbers = #tpu.dot_dimension_numbers<[1], [0], [0], [1], [0, 0, 1, 1], [], []>} : vector<8x4xf32>, vector<4x512xf32>, vector<8x512xf32> -> vector<8x512xf32>
    %15 = arith.addf %6, %14 : vector<8x512xf32>
    %16 = vector.extract_strided_slice %5 {offsets = [0, 112], sizes = [4, 512], strides = [1, 1]} : vector<4x768xf32> to vector<4x512xf32>
    %c1 = arith.constant 1 : index
    %c0_15 = arith.constant 0 : index
    %c0_16 = arith.constant 0 : index
    %17 = vector.load %arg1[%c1, %c0_15, %c0_16] : memref<9x1x512xf32, #tpu.memory_space<vmem>>, vector<1x1x512xf32>
    %18 = vector.shape_cast %17 : vector<1x1x512xf32> to vector<1x512xf32>
    %19 = vector.broadcast %18 : vector<1x512xf32> to vector<4x512xf32>
    %20 = arith.mulf %16, %19 : vector<4x512xf32>
    %c1_17 = arith.constant 1 : index
    %c0_18 = arith.constant 0 : index
    %c0_19 = arith.constant 0 : index
    %21 = vector.load %arg2[%c1_17, %c0_18, %c0_19] : memref<9x8x4xf32, #tpu.memory_space<vmem>>, vector<1x8x4xf32>
    %22 = vector.shape_cast %21 : vector<1x8x4xf32> to vector<8x4xf32>
    %cst_20 = arith.constant dense<0.000000e+00> : vector<8x512xf32>
    %23 = tpu.matmul %22, %20, %cst_20 {dimension_numbers = #tpu.dot_dimension_numbers<[1], [0], [0], [1], [0, 0, 1, 1], [], []>} : vector<8x4xf32>, vector<4x512xf32>, vector<8x512xf32> -> vector<8x512xf32>
    %24 = arith.addf %15, %23 : vector<8x512xf32>
    %25 = vector.extract_strided_slice %5 {offsets = [0, 113], sizes = [4, 512], strides = [1, 1]} : vector<4x768xf32> to vector<4x512xf32>
    %c2 = arith.constant 2 : index
    %c0_21 = arith.constant 0 : index
    %c0_22 = arith.constant 0 : index
    %26 = vector.load %arg1[%c2, %c0_21, %c0_22] : memref<9x1x512xf32, #tpu.memory_space<vmem>>, vector<1x1x512xf32>
    %27 = vector.shape_cast %26 : vector<1x1x512xf32> to vector<1x512xf32>
    %28 = vector.broadcast %27 : vector<1x512xf32> to vector<4x512xf32>
    %29 = arith.mulf %25, %28 : vector<4x512xf32>
    %c2_23 = arith.constant 2 : index
    %c0_24 = arith.constant 0 : index
    %c0_25 = arith.constant 0 : index
    %30 = vector.load %arg2[%c2_23, %c0_24, %c0_25] : memref<9x8x4xf32, #tpu.memory_space<vmem>>, vector<1x8x4xf32>
    %31 = vector.shape_cast %30 : vector<1x8x4xf32> to vector<8x4xf32>
    %cst_26 = arith.constant dense<0.000000e+00> : vector<8x512xf32>
    %32 = tpu.matmul %31, %29, %cst_26 {dimension_numbers = #tpu.dot_dimension_numbers<[1], [0], [0], [1], [0, 0, 1, 1], [], []>} : vector<8x4xf32>, vector<4x512xf32>, vector<8x512xf32> -> vector<8x512xf32>
    %33 = arith.addf %24, %32 : vector<8x512xf32>
    %34 = vector.extract_strided_slice %5 {offsets = [0, 127], sizes = [4, 512], strides = [1, 1]} : vector<4x768xf32> to vector<4x512xf32>
    %c3 = arith.constant 3 : index
    %c0_27 = arith.constant 0 : index
    %c0_28 = arith.constant 0 : index
    %35 = vector.load %arg1[%c3, %c0_27, %c0_28] : memref<9x1x512xf32, #tpu.memory_space<vmem>>, vector<1x1x512xf32>
    %36 = vector.shape_cast %35 : vector<1x1x512xf32> to vector<1x512xf32>
    %37 = vector.broadcast %36 : vector<1x512xf32> to vector<4x512xf32>
    %38 = arith.mulf %34, %37 : vector<4x512xf32>
    %c3_29 = arith.constant 3 : index
    %c0_30 = arith.constant 0 : index
    %c0_31 = arith.constant 0 : index
    %39 = vector.load %arg2[%c3_29, %c0_30, %c0_31] : memref<9x8x4xf32, #tpu.memory_space<vmem>>, vector<1x8x4xf32>
    %40 = vector.shape_cast %39 : vector<1x8x4xf32> to vector<8x4xf32>
    %cst_32 = arith.constant dense<0.000000e+00> : vector<8x512xf32>
    %41 = tpu.matmul %40, %38, %cst_32 {dimension_numbers = #tpu.dot_dimension_numbers<[1], [0], [0], [1], [0, 0, 1, 1], [], []>} : vector<8x4xf32>, vector<4x512xf32>, vector<8x512xf32> -> vector<8x512xf32>
    %42 = arith.addf %33, %41 : vector<8x512xf32>
    %43 = vector.extract_strided_slice %5 {offsets = [0, 128], sizes = [4, 512], strides = [1, 1]} : vector<4x768xf32> to vector<4x512xf32>
    %c4 = arith.constant 4 : index
    %c0_33 = arith.constant 0 : index
    %c0_34 = arith.constant 0 : index
    %44 = vector.load %arg2[%c4, %c0_33, %c0_34] : memref<9x8x4xf32, #tpu.memory_space<vmem>>, vector<1x8x4xf32>
    %45 = vector.shape_cast %44 : vector<1x8x4xf32> to vector<8x4xf32>
    %cst_35 = arith.constant dense<0.000000e+00> : vector<8x512xf32>
    %46 = tpu.matmul %45, %43, %cst_35 {dimension_numbers = #tpu.dot_dimension_numbers<[1], [0], [0], [1], [0, 0, 1, 1], [], []>} : vector<8x4xf32>, vector<4x512xf32>, vector<8x512xf32> -> vector<8x512xf32>
    %47 = arith.addf %42, %46 : vector<8x512xf32>
    %48 = vector.extract_strided_slice %5 {offsets = [0, 129], sizes = [4, 512], strides = [1, 1]} : vector<4x768xf32> to vector<4x512xf32>
    %c5 = arith.constant 5 : index
    %c0_36 = arith.constant 0 : index
    %c0_37 = arith.constant 0 : index
    %49 = vector.load %arg1[%c5, %c0_36, %c0_37] : memref<9x1x512xf32, #tpu.memory_space<vmem>>, vector<1x1x512xf32>
    %50 = vector.shape_cast %49 : vector<1x1x512xf32> to vector<1x512xf32>
    %51 = vector.broadcast %50 : vector<1x512xf32> to vector<4x512xf32>
    %52 = arith.mulf %48, %51 : vector<4x512xf32>
    %c5_38 = arith.constant 5 : index
    %c0_39 = arith.constant 0 : index
    %c0_40 = arith.constant 0 : index
    %53 = vector.load %arg2[%c5_38, %c0_39, %c0_40] : memref<9x8x4xf32, #tpu.memory_space<vmem>>, vector<1x8x4xf32>
    %54 = vector.shape_cast %53 : vector<1x8x4xf32> to vector<8x4xf32>
    %cst_41 = arith.constant dense<0.000000e+00> : vector<8x512xf32>
    %55 = tpu.matmul %54, %52, %cst_41 {dimension_numbers = #tpu.dot_dimension_numbers<[1], [0], [0], [1], [0, 0, 1, 1], [], []>} : vector<8x4xf32>, vector<4x512xf32>, vector<8x512xf32> -> vector<8x512xf32>
    %56 = arith.addf %47, %55 : vector<8x512xf32>
    %57 = vector.extract_strided_slice %5 {offsets = [0, 143], sizes = [4, 512], strides = [1, 1]} : vector<4x768xf32> to vector<4x512xf32>
    %c6 = arith.constant 6 : index
    %c0_42 = arith.constant 0 : index
    %c0_43 = arith.constant 0 : index
    %58 = vector.load %arg1[%c6, %c0_42, %c0_43] : memref<9x1x512xf32, #tpu.memory_space<vmem>>, vector<1x1x512xf32>
    %59 = vector.shape_cast %58 : vector<1x1x512xf32> to vector<1x512xf32>
    %60 = vector.broadcast %59 : vector<1x512xf32> to vector<4x512xf32>
    %61 = arith.mulf %57, %60 : vector<4x512xf32>
    %c6_44 = arith.constant 6 : index
    %c0_45 = arith.constant 0 : index
    %c0_46 = arith.constant 0 : index
    %62 = vector.load %arg2[%c6_44, %c0_45, %c0_46] : memref<9x8x4xf32, #tpu.memory_space<vmem>>, vector<1x8x4xf32>
    %63 = vector.shape_cast %62 : vector<1x8x4xf32> to vector<8x4xf32>
    %cst_47 = arith.constant dense<0.000000e+00> : vector<8x512xf32>
    %64 = tpu.matmul %63, %61, %cst_47 {dimension_numbers = #tpu.dot_dimension_numbers<[1], [0], [0], [1], [0, 0, 1, 1], [], []>} : vector<8x4xf32>, vector<4x512xf32>, vector<8x512xf32> -> vector<8x512xf32>
    %65 = arith.addf %56, %64 : vector<8x512xf32>
    %66 = vector.extract_strided_slice %5 {offsets = [0, 144], sizes = [4, 512], strides = [1, 1]} : vector<4x768xf32> to vector<4x512xf32>
    %c7 = arith.constant 7 : index
    %c0_48 = arith.constant 0 : index
    %c0_49 = arith.constant 0 : index
    %67 = vector.load %arg1[%c7, %c0_48, %c0_49] : memref<9x1x512xf32, #tpu.memory_space<vmem>>, vector<1x1x512xf32>
    %68 = vector.shape_cast %67 : vector<1x1x512xf32> to vector<1x512xf32>
    %69 = vector.broadcast %68 : vector<1x512xf32> to vector<4x512xf32>
    %70 = arith.mulf %66, %69 : vector<4x512xf32>
    %c7_50 = arith.constant 7 : index
    %c0_51 = arith.constant 0 : index
    %c0_52 = arith.constant 0 : index
    %71 = vector.load %arg2[%c7_50, %c0_51, %c0_52] : memref<9x8x4xf32, #tpu.memory_space<vmem>>, vector<1x8x4xf32>
    %72 = vector.shape_cast %71 : vector<1x8x4xf32> to vector<8x4xf32>
    %cst_53 = arith.constant dense<0.000000e+00> : vector<8x512xf32>
    %73 = tpu.matmul %72, %70, %cst_53 {dimension_numbers = #tpu.dot_dimension_numbers<[1], [0], [0], [1], [0, 0, 1, 1], [], []>} : vector<8x4xf32>, vector<4x512xf32>, vector<8x512xf32> -> vector<8x512xf32>
    %74 = arith.addf %65, %73 : vector<8x512xf32>
    %75 = vector.extract_strided_slice %5 {offsets = [0, 145], sizes = [4, 512], strides = [1, 1]} : vector<4x768xf32> to vector<4x512xf32>
    %c8 = arith.constant 8 : index
    %c0_54 = arith.constant 0 : index
    %c0_55 = arith.constant 0 : index
    %76 = vector.load %arg1[%c8, %c0_54, %c0_55] : memref<9x1x512xf32, #tpu.memory_space<vmem>>, vector<1x1x512xf32>
    %77 = vector.shape_cast %76 : vector<1x1x512xf32> to vector<1x512xf32>
    %78 = vector.broadcast %77 : vector<1x512xf32> to vector<4x512xf32>
    %79 = arith.mulf %75, %78 : vector<4x512xf32>
    %c8_56 = arith.constant 8 : index
    %c0_57 = arith.constant 0 : index
    %c0_58 = arith.constant 0 : index
    %80 = vector.load %arg2[%c8_56, %c0_57, %c0_58] : memref<9x8x4xf32, #tpu.memory_space<vmem>>, vector<1x8x4xf32>
    %81 = vector.shape_cast %80 : vector<1x8x4xf32> to vector<8x4xf32>
    %cst_59 = arith.constant dense<0.000000e+00> : vector<8x512xf32>
    %82 = tpu.matmul %81, %79, %cst_59 {dimension_numbers = #tpu.dot_dimension_numbers<[1], [0], [0], [1], [0, 0, 1, 1], [], []>} : vector<8x4xf32>, vector<4x512xf32>, vector<8x512xf32> -> vector<8x512xf32>
    %83 = arith.addf %74, %82 : vector<8x512xf32>
    %c0_60 = arith.constant 0 : index
    %c0_61 = arith.constant 0 : index
    %84 = vector.load %arg3[%c0_60, %c0_61] : memref<8x1xf32, #tpu.memory_space<vmem>>, vector<8x1xf32>
    %85 = vector.broadcast %84 : vector<8x1xf32> to vector<8x512xf32>
    %86 = arith.addf %83, %85 : vector<8x512xf32>
    %cst_62 = arith.constant 0.000000e+00 : f32
    %87 = vector.broadcast %cst_62 : f32 to vector<8x512xf32>
    %88 = arith.maximumf %86, %87 : vector<8x512xf32>
    %cst_63 = arith.constant 0.000000e+00 : f32
    %89 = vector.broadcast %cst_63 : f32 to vector<8x128xf32>
    %c0_64 = arith.constant 0 : index
    %c0_65 = arith.constant 0 : index
    %90 = vector.load %arg8[%c0_64, %c0_65] : memref<8x768xf32, #tpu.memory_space<vmem>>, vector<8x128xf32>
    tpu.vector_store %arg8[%c0_64, %c0_65], %89 {strides = array<i32>} : memref<8x768xf32, #tpu.memory_space<vmem>>, vector<8x128xf32>,
    %c0_66 = arith.constant 0 : index
    %c640_67 = arith.constant 640 : index
    %91 = vector.load %arg8[%c0_66, %c640_67] : memref<8x768xf32, #tpu.memory_space<vmem>>, vector<8x128xf32>
    tpu.vector_store %arg8[%c0_66, %c640_67], %89 {strides = array<i32>} : memref<8x768xf32, #tpu.memory_space<vmem>>, vector<8x128xf32>,
    %c0_68 = arith.constant 0 : index
    %c128_69 = arith.constant 128 : index
    %92 = vector.load %arg8[%c0_68, %c128_69] : memref<8x768xf32, #tpu.memory_space<vmem>>, vector<8x512xf32>
    tpu.vector_store %arg8[%c0_68, %c128_69], %88 {strides = array<i32>} : memref<8x768xf32, #tpu.memory_space<vmem>>, vector<8x512xf32>,
    %c0_70 = arith.constant 0 : index
    %c0_71 = arith.constant 0 : index
    %93 = vector.load %arg8[%c0_70, %c0_71] : memref<8x768xf32, #tpu.memory_space<vmem>>, vector<8x768xf32>
    %cst_72 = arith.constant 0.000000e+00 : f32
    %94 = vector.broadcast %cst_72 : f32 to vector<8x512xf32>
    %95 = vector.extract_strided_slice %93 {offsets = [0, 111], sizes = [8, 512], strides = [1, 1]} : vector<8x768xf32> to vector<8x512xf32>
    %c0_73 = arith.constant 0 : index
    %c0_74 = arith.constant 0 : index
    %c0_75 = arith.constant 0 : index
    %96 = vector.load %arg1[%c0_73, %c0_74, %c0_75] : memref<9x1x512xf32, #tpu.memory_space<vmem>>, vector<1x1x512xf32>
    %97 = vector.shape_cast %96 : vector<1x1x512xf32> to vector<1x512xf32>
    %98 = vector.broadcast %97 : vector<1x512xf32> to vector<8x512xf32>
    %99 = arith.mulf %95, %98 : vector<8x512xf32>
    %c0_76 = arith.constant 0 : index
    %c0_77 = arith.constant 0 : index
    %c0_78 = arith.constant 0 : index
    %100 = vector.load %arg4[%c0_76, %c0_77, %c0_78] : memref<9x8x8xf32, #tpu.memory_space<vmem>>, vector<1x8x8xf32>
    %101 = vector.shape_cast %100 : vector<1x8x8xf32> to vector<8x8xf32>
    %cst_79 = arith.constant dense<0.000000e+00> : vector<8x512xf32>
    %102 = tpu.matmul %101, %99, %cst_79 {dimension_numbers = #tpu.dot_dimension_numbers<[1], [0], [0], [1], [0, 0, 1, 1], [], []>} : vector<8x8xf32>, vector<8x512xf32>, vector<8x512xf32> -> vector<8x512xf32>
    %103 = arith.addf %94, %102 : vector<8x512xf32>
    %104 = vector.extract_strided_slice %93 {offsets = [0, 112], sizes = [8, 512], strides = [1, 1]} : vector<8x768xf32> to vector<8x512xf32>
    %c1_80 = arith.constant 1 : index
    %c0_81 = arith.constant 0 : index
    %c0_82 = arith.constant 0 : index
    %105 = vector.load %arg1[%c1_80, %c0_81, %c0_82] : memref<9x1x512xf32, #tpu.memory_space<vmem>>, vector<1x1x512xf32>
    %106 = vector.shape_cast %105 : vector<1x1x512xf32> to vector<1x512xf32>
    %107 = vector.broadcast %106 : vector<1x512xf32> to vector<8x512xf32>
    %108 = arith.mulf %104, %107 : vector<8x512xf32>
    %c1_83 = arith.constant 1 : index
    %c0_84 = arith.constant 0 : index
    %c0_85 = arith.constant 0 : index
    %109 = vector.load %arg4[%c1_83, %c0_84, %c0_85] : memref<9x8x8xf32, #tpu.memory_space<vmem>>, vector<1x8x8xf32>
    %110 = vector.shape_cast %109 : vector<1x8x8xf32> to vector<8x8xf32>
    %cst_86 = arith.constant dense<0.000000e+00> : vector<8x512xf32>
    %111 = tpu.matmul %110, %108, %cst_86 {dimension_numbers = #tpu.dot_dimension_numbers<[1], [0], [0], [1], [0, 0, 1, 1], [], []>} : vector<8x8xf32>, vector<8x512xf32>, vector<8x512xf32> -> vector<8x512xf32>
    %112 = arith.addf %103, %111 : vector<8x512xf32>
    %113 = vector.extract_strided_slice %93 {offsets = [0, 113], sizes = [8, 512], strides = [1, 1]} : vector<8x768xf32> to vector<8x512xf32>
    %c2_87 = arith.constant 2 : index
    %c0_88 = arith.constant 0 : index
    %c0_89 = arith.constant 0 : index
    %114 = vector.load %arg1[%c2_87, %c0_88, %c0_89] : memref<9x1x512xf32, #tpu.memory_space<vmem>>, vector<1x1x512xf32>
    %115 = vector.shape_cast %114 : vector<1x1x512xf32> to vector<1x512xf32>
    %116 = vector.broadcast %115 : vector<1x512xf32> to vector<8x512xf32>
    %117 = arith.mulf %113, %116 : vector<8x512xf32>
    %c2_90 = arith.constant 2 : index
    %c0_91 = arith.constant 0 : index
    %c0_92 = arith.constant 0 : index
    %118 = vector.load %arg4[%c2_90, %c0_91, %c0_92] : memref<9x8x8xf32, #tpu.memory_space<vmem>>, vector<1x8x8xf32>
    %119 = vector.shape_cast %118 : vector<1x8x8xf32> to vector<8x8xf32>
    %cst_93 = arith.constant dense<0.000000e+00> : vector<8x512xf32>
    %120 = tpu.matmul %119, %117, %cst_93 {dimension_numbers = #tpu.dot_dimension_numbers<[1], [0], [0], [1], [0, 0, 1, 1], [], []>} : vector<8x8xf32>, vector<8x512xf32>, vector<8x512xf32> -> vector<8x512xf32>
    %121 = arith.addf %112, %120 : vector<8x512xf32>
    %122 = vector.extract_strided_slice %93 {offsets = [0, 127], sizes = [8, 512], strides = [1, 1]} : vector<8x768xf32> to vector<8x512xf32>
    %c3_94 = arith.constant 3 : index
    %c0_95 = arith.constant 0 : index
    %c0_96 = arith.constant 0 : index
    %123 = vector.load %arg1[%c3_94, %c0_95, %c0_96] : memref<9x1x512xf32, #tpu.memory_space<vmem>>, vector<1x1x512xf32>
    %124 = vector.shape_cast %123 : vector<1x1x512xf32> to vector<1x512xf32>
    %125 = vector.broadcast %124 : vector<1x512xf32> to vector<8x512xf32>
    %126 = arith.mulf %122, %125 : vector<8x512xf32>
    %c3_97 = arith.constant 3 : index
    %c0_98 = arith.constant 0 : index
    %c0_99 = arith.constant 0 : index
    %127 = vector.load %arg4[%c3_97, %c0_98, %c0_99] : memref<9x8x8xf32, #tpu.memory_space<vmem>>, vector<1x8x8xf32>
    %128 = vector.shape_cast %127 : vector<1x8x8xf32> to vector<8x8xf32>
    %cst_100 = arith.constant dense<0.000000e+00> : vector<8x512xf32>
    %129 = tpu.matmul %128, %126, %cst_100 {dimension_numbers = #tpu.dot_dimension_numbers<[1], [0], [0], [1], [0, 0, 1, 1], [], []>} : vector<8x8xf32>, vector<8x512xf32>, vector<8x512xf32> -> vector<8x512xf32>
    %130 = arith.addf %121, %129 : vector<8x512xf32>
    %131 = vector.extract_strided_slice %93 {offsets = [0, 128], sizes = [8, 512], strides = [1, 1]} : vector<8x768xf32> to vector<8x512xf32>
    %c4_101 = arith.constant 4 : index
    %c0_102 = arith.constant 0 : index
    %c0_103 = arith.constant 0 : index
    %132 = vector.load %arg4[%c4_101, %c0_102, %c0_103] : memref<9x8x8xf32, #tpu.memory_space<vmem>>, vector<1x8x8xf32>
    %133 = vector.shape_cast %132 : vector<1x8x8xf32> to vector<8x8xf32>
    %cst_104 = arith.constant dense<0.000000e+00> : vector<8x512xf32>
    %134 = tpu.matmul %133, %131, %cst_104 {dimension_numbers = #tpu.dot_dimension_numbers<[1], [0], [0], [1], [0, 0, 1, 1], [], []>} : vector<8x8xf32>, vector<8x512xf32>, vector<8x512xf32> -> vector<8x512xf32>
    %135 = arith.addf %130, %134 : vector<8x512xf32>
    %136 = vector.extract_strided_slice %93 {offsets = [0, 129], sizes = [8, 512], strides = [1, 1]} : vector<8x768xf32> to vector<8x512xf32>
    %c5_105 = arith.constant 5 : index
    %c0_106 = arith.constant 0 : index
    %c0_107 = arith.constant 0 : index
    %137 = vector.load %arg1[%c5_105, %c0_106, %c0_107] : memref<9x1x512xf32, #tpu.memory_space<vmem>>, vector<1x1x512xf32>
    %138 = vector.shape_cast %137 : vector<1x1x512xf32> to vector<1x512xf32>
    %139 = vector.broadcast %138 : vector<1x512xf32> to vector<8x512xf32>
    %140 = arith.mulf %136, %139 : vector<8x512xf32>
    %c5_108 = arith.constant 5 : index
    %c0_109 = arith.constant 0 : index
    %c0_110 = arith.constant 0 : index
    %141 = vector.load %arg4[%c5_108, %c0_109, %c0_110] : memref<9x8x8xf32, #tpu.memory_space<vmem>>, vector<1x8x8xf32>
    %142 = vector.shape_cast %141 : vector<1x8x8xf32> to vector<8x8xf32>
    %cst_111 = arith.constant dense<0.000000e+00> : vector<8x512xf32>
    %143 = tpu.matmul %142, %140, %cst_111 {dimension_numbers = #tpu.dot_dimension_numbers<[1], [0], [0], [1], [0, 0, 1, 1], [], []>} : vector<8x8xf32>, vector<8x512xf32>, vector<8x512xf32> -> vector<8x512xf32>
    %144 = arith.addf %135, %143 : vector<8x512xf32>
    %145 = vector.extract_strided_slice %93 {offsets = [0, 143], sizes = [8, 512], strides = [1, 1]} : vector<8x768xf32> to vector<8x512xf32>
    %c6_112 = arith.constant 6 : index
    %c0_113 = arith.constant 0 : index
    %c0_114 = arith.constant 0 : index
    %146 = vector.load %arg1[%c6_112, %c0_113, %c0_114] : memref<9x1x512xf32, #tpu.memory_space<vmem>>, vector<1x1x512xf32>
    %147 = vector.shape_cast %146 : vector<1x1x512xf32> to vector<1x512xf32>
    %148 = vector.broadcast %147 : vector<1x512xf32> to vector<8x512xf32>
    %149 = arith.mulf %145, %148 : vector<8x512xf32>
    %c6_115 = arith.constant 6 : index
    %c0_116 = arith.constant 0 : index
    %c0_117 = arith.constant 0 : index
    %150 = vector.load %arg4[%c6_115, %c0_116, %c0_117] : memref<9x8x8xf32, #tpu.memory_space<vmem>>, vector<1x8x8xf32>
    %151 = vector.shape_cast %150 : vector<1x8x8xf32> to vector<8x8xf32>
    %cst_118 = arith.constant dense<0.000000e+00> : vector<8x512xf32>
    %152 = tpu.matmul %151, %149, %cst_118 {dimension_numbers = #tpu.dot_dimension_numbers<[1], [0], [0], [1], [0, 0, 1, 1], [], []>} : vector<8x8xf32>, vector<8x512xf32>, vector<8x512xf32> -> vector<8x512xf32>
    %153 = arith.addf %144, %152 : vector<8x512xf32>
    %154 = vector.extract_strided_slice %93 {offsets = [0, 144], sizes = [8, 512], strides = [1, 1]} : vector<8x768xf32> to vector<8x512xf32>
    %c7_119 = arith.constant 7 : index
    %c0_120 = arith.constant 0 : index
    %c0_121 = arith.constant 0 : index
    %155 = vector.load %arg1[%c7_119, %c0_120, %c0_121] : memref<9x1x512xf32, #tpu.memory_space<vmem>>, vector<1x1x512xf32>
    %156 = vector.shape_cast %155 : vector<1x1x512xf32> to vector<1x512xf32>
    %157 = vector.broadcast %156 : vector<1x512xf32> to vector<8x512xf32>
    %158 = arith.mulf %154, %157 : vector<8x512xf32>
    %c7_122 = arith.constant 7 : index
    %c0_123 = arith.constant 0 : index
    %c0_124 = arith.constant 0 : index
    %159 = vector.load %arg4[%c7_122, %c0_123, %c0_124] : memref<9x8x8xf32, #tpu.memory_space<vmem>>, vector<1x8x8xf32>
    %160 = vector.shape_cast %159 : vector<1x8x8xf32> to vector<8x8xf32>
    %cst_125 = arith.constant dense<0.000000e+00> : vector<8x512xf32>
    %161 = tpu.matmul %160, %158, %cst_125 {dimension_numbers = #tpu.dot_dimension_numbers<[1], [0], [0], [1], [0, 0, 1, 1], [], []>} : vector<8x8xf32>, vector<8x512xf32>, vector<8x512xf32> -> vector<8x512xf32>
    %162 = arith.addf %153, %161 : vector<8x512xf32>
    %163 = vector.extract_strided_slice %93 {offsets = [0, 145], sizes = [8, 512], strides = [1, 1]} : vector<8x768xf32> to vector<8x512xf32>
    %c8_126 = arith.constant 8 : index
    %c0_127 = arith.constant 0 : index
    %c0_128 = arith.constant 0 : index
    %164 = vector.load %arg1[%c8_126, %c0_127, %c0_128] : memref<9x1x512xf32, #tpu.memory_space<vmem>>, vector<1x1x512xf32>
    %165 = vector.shape_cast %164 : vector<1x1x512xf32> to vector<1x512xf32>
    %166 = vector.broadcast %165 : vector<1x512xf32> to vector<8x512xf32>
    %167 = arith.mulf %163, %166 : vector<8x512xf32>
    %c8_129 = arith.constant 8 : index
    %c0_130 = arith.constant 0 : index
    %c0_131 = arith.constant 0 : index
    %168 = vector.load %arg4[%c8_129, %c0_130, %c0_131] : memref<9x8x8xf32, #tpu.memory_space<vmem>>, vector<1x8x8xf32>
    %169 = vector.shape_cast %168 : vector<1x8x8xf32> to vector<8x8xf32>
    %cst_132 = arith.constant dense<0.000000e+00> : vector<8x512xf32>
    %170 = tpu.matmul %169, %167, %cst_132 {dimension_numbers = #tpu.dot_dimension_numbers<[1], [0], [0], [1], [0, 0, 1, 1], [], []>} : vector<8x8xf32>, vector<8x512xf32>, vector<8x512xf32> -> vector<8x512xf32>
    %171 = arith.addf %162, %170 : vector<8x512xf32>
    %c0_133 = arith.constant 0 : index
    %c0_134 = arith.constant 0 : index
    %172 = vector.load %arg5[%c0_133, %c0_134] : memref<8x1xf32, #tpu.memory_space<vmem>>, vector<8x1xf32>
    %173 = vector.broadcast %172 : vector<8x1xf32> to vector<8x512xf32>
    %174 = arith.addf %171, %173 : vector<8x512xf32>
    %cst_135 = arith.constant 0.000000e+00 : f32
    %175 = vector.broadcast %cst_135 : f32 to vector<8x512xf32>
    %176 = arith.maximumf %174, %175 : vector<8x512xf32>
    %c0_136 = arith.constant 0 : index
    %c0_137 = arith.constant 0 : index
    %177 = vector.load %arg6[%c0_136, %c0_137] : memref<8x512xf32, #tpu.memory_space<vmem>>, vector<8x512xf32>
    tpu.vector_store %arg6[%c0_136, %c0_137], %176 {strides = array<i32>} : memref<8x512xf32, #tpu.memory_space<vmem>>, vector<8x512xf32>,
    return
  }
}

</mosaic_0001>

<bundles_post_ra>
// kernel: multilayer_forward.1
= control target key start
LH: loop header
LB: loop body
LE: loop exit
PB: predicated region body
PF: predicated region fallthrough
CT: control target
= control target key end

     0   :  { %v34_v0 = vlaneseq  ;;  %v3874_v10 = vmov 0.0   ;;  %s3875_s30 = smov 112   ;;  %s3876_s7 = smov 111   ;;  %vm58_vm0 = vcmask 908288   ;;  %vm97_vm1 = vcmask 916480   ;;  %s4647_s1 = inlined_call_operand.vmem [shape: f32[9,1,512], index: 1, kind: input, shape index: {}]   ;;  %s4648_s0 = inlined_call_operand.vmem [shape: f32[4,512], index: 0, kind: input, shape index: {}]   ;;  %s4649_s3 = inlined_call_operand.vmem [shape: f32[8,1], index: 3, kind: input, shape index: {}]   ;;  %s4650_s2 = inlined_call_operand.vmem [shape: f32[9,8,4], index: 2, kind: input, shape index: {}]   ;;  %s4651_s5 = inlined_call_operand.vmem [shape: f32[8,1], index: 5, kind: input, shape index: {}]   ;;  %s4652_s4 = inlined_call_operand.vmem [shape: f32[9,8,8], index: 4, kind: input, shape index: {}]   ;;  %s4653_s6 = inlined_call_operand.vmem [shape: f32[8,512], index: 6, kind: output, shape index: {}]  }
   0x1   :  { %v24_v2 = vld [vmem:[%s4648_s0 + $0x8] sm:$0xff]  ;;  %v3759_v3 = vld [vmem:[%s4647_s1 + $0x4] sm:$0xf]  ;;  %v32_v4 = vld [vmem:[%s4647_s1] sm:$0xf]  ;;  %205 = vmatprep.mubr.f32.mxu0 %v3874_v10  ;;  %276 = vmatprep.mubr.f32.mxu1 %v3874_v10  ;;  %s3877_s10 = smov 113  }
   0x2   :  { %v35_v1 = vshrl.u32 %v34_v0, 7  ;;  %28 = vst [vmem:[#allocation2 + $0xc] sm:$0xff] %v24_v2  ;;  %v23_v5 = vld [vmem:[%s4648_s0] sm:$0xff]  ;;  %26 = vst [vmem:[#allocation2 + $0x14] sm:$0xf] %v3874_v10  ;;  %s3878_s11 = smov 127  }
   0x3   :  { %25 = vst [vmem:[#allocation2] sm:$0xf] %v3874_v10  ;;  %27 = vst [vmem:[#allocation2 + $0x4] sm:$0xff] %v23_v5  ;;  %v3773_v15 = vld [vmem:[%s4647_s1 + $0x8] sm:$0xf]  ;;  %s3879_s12 = smov 16  }
   0x4   :  { %v3931_v6 = vsub.s32 0, %v35_v1  ;;  %v3933_v7 = vsub.s32 1, %v35_v1  ;;  %v3935_v8 = vsub.s32 2, %v35_v1  ;;  %v3937_v9 = vsub.s32 3, %v35_v1  ;;  %v3781_v28 = vld [vmem:[%s4647_s1 + $0xc] sm:$0xf] }
   0x5   :  { %s3880_s13 = smov 17   ;;  %s3881_s14 = smov 15   ;;  %vm699_vm2 = vcmask 1039360   ;;  %vm60_vm3 = vcmask 1043456   ;;  %vm483_vm4 = vcmask 924672   ;;  %vm124_vm5 = vcmask 130048  }
   0x6   :  { %v76_v11 = vrot.slane %v3759_v3, %v3931_v6  ;;  %v80_v12 = vrot.slane %v3759_v3, %v3933_v7  ;;  %v37_v13 = vrot.slane %v32_v4, %v3931_v6  ;;  %v41_v14 = vrot.slane %v32_v4, %v3933_v7  ;;  %s3882_s15 = smov 1  }
   0x7   :  { %v84_v16 = vrot.slane %v3759_v3, %v3935_v8  ;;  %v88_v17 = vrot.slane %v3759_v3, %v3937_v9  ;;  %v45_v18 = vrot.slane %v32_v4, %v3935_v8  ;;  %v49_v19 = vrot.slane %v32_v4, %v3937_v9 }
   0x8   :  { %v89_v20 = vcombine.low %v76_v11, %v80_v12  ;;  %v50_v21 = vcombine.low %v37_v13, %v41_v14  ;;  %v462_v23 = vrot.slane %v3773_v15, %v3931_v6  ;;  %v466_v24 = vrot.slane %v3773_v15, %v3933_v7 }
   0x9   :  { %v90_v22 = vcombine.low %v84_v16, %v88_v17  ;;  %v51_v25 = vcombine.low %v45_v18, %v49_v19  ;;  %v470_v26 = vrot.slane %v3773_v15, %v3935_v8  ;;  %v474_v27 = vrot.slane %v3773_v15, %v3937_v9  ;;  %v3973_v41 = vld [vmem:[#allocation2 + $0x10] sm:$0xff] }
   0xa   :  { %91 = vrot.lane.b32.xlu0 %v89_v20, %s3875_s30  ;;  %52 = vrot.lane.b32.xlu1 %v50_v21, %s3876_s7  ;;  %v475_v29 = vcombine.low %v462_v23, %v466_v24  ;;  %v678_v30 = vrot.slane %v3781_v28, %v3931_v6  ;;  %v682_v31 = vrot.slane %v3781_v28, %v3933_v7  ;;  %v3981_v55 = vld [vmem:[#allocation2] sm:$0xff]  ;;  %v3999_v11 = vld [vmem:[#allocation2 + $0x8] sm:$0xff]  ;;  %vm298_vm6 = vcmask 138240  }
   0xb   :  { %v476_v32 = vcombine.low %v470_v26, %v474_v27  ;;  %v686_v33 = vrot.slane %v3781_v28, %v3935_v8  ;;  %v690_v34 = vrot.slane %v3781_v28, %v3937_v9  ;;  %vm129_vm7 = vcmask 31744  }
   0xc   :  { %v691_v35 = vcombine.low %v678_v30, %v682_v31  ;;  %v3883_v30 = vmov 0   ;;  %vm510_vm8 = vcmask 121856   ;;  %vm726_vm9 = vcmask 7168  }
   0xd   :  { %v692_v36 = vcombine.low %v686_v33, %v690_v34  ;;  %3871 = vset.pattern.permute.xlu0 %v3883_v30  ;;  %v1864_v33 = vld [vmem:[%s4649_s3] sm:$0xff]  ;;  %vm1994_vm10 = vcmask 64512  }
   0xe   :  { %93 = vrot.lane.b32.xlu0 %v90_v22, %s3875_s30  ;;  %54 = vrot.lane.b32.xlu1 %v51_v25, %s3876_s7 }
  0x12   :  { %477 = vrot.lane.b32.xlu0 %v475_v29, %s3877_s10  ;;  %479 = vrot.lane.b32.xlu1 %v476_v32, %s3877_s10  ;;  %v3828_v29 = vld [vmem:[%s4647_s1 + $0x4] sm:$0xf] }
  0x13   :  { %v1935_v31 = vrot.slane %v3828_v29, %v3931_v6  ;;  %v1939_v32 = vrot.slane %v3828_v29, %v3933_v7  ;;  %v1943_v34 = vrot.slane %v3828_v29, %v3935_v8 }
  0x16   :  { %693 = vrot.lane.b32.xlu0 %v691_v35, %s3878_s11  ;;  %695 = vrot.lane.b32.xlu1 %v692_v36, %s3878_s11  ;;  %v1947_v35 = vrot.slane %v3828_v29, %v3937_v9  ;;  %v1890_v36 = vld [vmem:[%s4647_s1] sm:$0xf] }
  0x7c   :  { %v92_v37 = vpop.permute.xlu0 %91  ;;  %v53_v38 = vpop.permute.xlu1 %52 }
  0x7d   :  { %v56_v46 = vrot.slane %v53_v38, 4  ;;  %v95_v51 = vrot.slane %v92_v37, 4 }
  0x7f   :  { %v59_v52 = vsel %vm58_vm0, %v56_v46, %v53_v38  ;;  %v98_v61 = vsel %vm97_vm1, %v95_v51, %v92_v37  ;;  %v1895_v37 = vrot.slane %v1890_v36, %v3931_v6  ;;  %v1899_v38 = vrot.slane %v1890_v36, %v3933_v7 }
  0x80   :  { %v94_v39 = vpop.permute.xlu0 %93  ;;  %v55_v40 = vpop.permute.xlu1 %54  ;;  %v66_v60 = vmul.f32 %v59_v52, %v3981_v55  ;;  %v104_v1 = vmul.f32 %v98_v61, %v3981_v55  ;;  %v3845_v52 = vld [vmem:[%s4647_s1 + $0x14] sm:$0xf] }
  0x81   :  { %v96_v42 = vrot.slane %v94_v39, 4  ;;  %v57_v43 = vrot.slane %v55_v40, 4 }
  0x82   :  { %v286_v21 = vcombine.high %v66_v60, %v66_v60  ;;  %v112_v22 = vcombine.high %v104_v1, %v104_v1 }
  0x83   :  { %v106_v44 = vmul.f32 %v96_v42, %v3973_v41  ;;  %v68_v45 = vmul.f32 %v57_v43, %v3973_v41  ;;  %v99_v62 = vsel %vm60_vm3, %v95_v51, %v96_v42  ;;  %v61_v4 = vsel %vm60_vm3, %v56_v46, %v57_v43  ;;  %v3834_v42 = vld [vmem:[%s4647_s1 + $0x8] sm:$0xf] }
  0x84   :  { %v478_v47 = vpop.permute.xlu0 %477  ;;  %v480_v48 = vpop.permute.xlu1 %479  ;;  %v100_v2 = vsel %vm97_vm1, %v99_v62, %v94_v39  ;;  %v62_v14 = vsel %vm58_vm0, %v61_v4, %v55_v40  ;;  %v1903_v39 = vrot.slane %v1890_v36, %v3935_v8  ;;  %v1907_v40 = vrot.slane %v1890_v36, %v3937_v9 }
  0x85   :  { %v482_v49 = vrot.slane %v480_v48, 4  ;;  %122 = vrot.lane.b32.xlu1 %v106_v44, %s3879_s12  ;;  %296 = vrot.lane.b32.xlu0 %v68_v45, %s3880_s13  ;;  %v481_v63 = vrot.slane %v478_v47, 4  ;;  %v105_v13 = vmul.f32 %v100_v2, %v3999_v11  ;;  %v67_v17 = vmul.f32 %v62_v14, %v3999_v11 }
  0x86   :  { %v2313_v43 = vrot.slane %v3834_v42, %v3931_v6  ;;  %v2317_v44 = vrot.slane %v3834_v42, %v3933_v7  ;;  %v2321_v45 = vrot.slane %v3834_v42, %v3935_v8  ;;  %v2325_v46 = vrot.slane %v3834_v42, %v3937_v9 }
  0x87   :  { %v492_v50 = vmul.f32 %v482_v49, %v3973_v41  ;;  %v484_v3 = vsel %vm483_vm4, %v481_v63, %v478_v47  ;;  %v485_v5 = vsel %vm60_vm3, %v481_v63, %v482_v49  ;;  %v113_v25 = vcombine.high %v105_v13, %v105_v13  ;;  %v3838_v47 = vld [vmem:[%s4647_s1 + $0xc] sm:$0xf]  ;;  %v3853_v63 = vld [vmem:[%s4647_s1 + $0x1c] sm:$0xf] }
  0x88   :  { %v694_v53 = vpop.permute.xlu0 %693  ;;  %v696_v54 = vpop.permute.xlu1 %695  ;;  %v490_v12 = vmul.f32 %v484_v3, %v3981_v55  ;;  %v486_v15 = vsel %vm483_vm4, %v485_v5, %v480_v48  ;;  %v287_v26 = vcombine.high %v67_v17, %v67_v17  ;;  %v2526_v48 = vrot.slane %v3838_v47, %v3931_v6  ;;  %v3857_v5 = vld [vmem:[%s4647_s1 + $0x20] sm:$0xf] }
  0x89   :  { %v697_v56 = vrot.slane %v694_v53, 4  ;;  %v698_v57 = vrot.slane %v696_v54, 4  ;;  %508 = vrot.lane.b32.xlu1 %v492_v50, %s3881_s14  ;;  %v491_v18 = vmul.f32 %v486_v15, %v3999_v11  ;;  %v2530_v49 = vrot.slane %v3838_v47, %v3933_v7 }
  0x8a   :  { %v498_v24 = vcombine.high %v490_v12, %v490_v12  ;;  %v2534_v50 = vrot.slane %v3838_v47, %v3935_v8  ;;  %v2538_v51 = vrot.slane %v3838_v47, %v3937_v9  ;;  %v3324_v3 = vrot.slane %v3853_v63, %v3935_v8 }
  0x8b   :  { %v700_v58 = vsel %vm699_vm2, %v697_v56, %v694_v53  ;;  %v708_v59 = vmul.f32 %v698_v57, %v3973_v41  ;;  %v701_v16 = vsel %vm60_vm3, %v697_v56, %v698_v57  ;;  %v499_v27 = vcombine.high %v491_v18, %v491_v18 }
  0x8c   :  { %v706_v0 = vmul.f32 %v700_v58, %v3981_v55  ;;  %v702_v19 = vsel %vm699_vm2, %v701_v16, %v696_v54  ;;  %v2890_v53 = vrot.slane %v3845_v52, %v3931_v6  ;;  %v2894_v54 = vrot.slane %v3845_v52, %v3933_v7  ;;  %v3849_v58 = vld [vmem:[%s4647_s1 + $0x18] sm:$0xf] }
  0x8d   :  { %724 = vrot.lane.b32.xlu0 %v708_v59, %s3882_s15  ;;  %288 = vrot.lane.b32.xlu1 %v66_v60, %s3880_s13  ;;  %v707_v20 = vmul.f32 %v702_v19, %v3999_v11  ;;  %v2898_v56 = vrot.slane %v3845_v52, %v3935_v8  ;;  %v2902_v57 = vrot.slane %v3845_v52, %v3937_v9 }
  0x8e   :  { %v714_v23 = vcombine.high %v706_v0, %v706_v0  ;;  %v3103_v59 = vrot.slane %v3849_v58, %v3931_v6  ;;  %v3107_v60 = vrot.slane %v3849_v58, %v3933_v7  ;;  %v3111_v61 = vrot.slane %v3849_v58, %v3935_v8 }
  0x8f   :  { %v715_v28 = vcombine.high %v707_v20, %v707_v20  ;;  %v3115_v62 = vrot.slane %v3849_v58, %v3937_v9  ;;  %v3328_v4 = vrot.slane %v3853_v63, %v3937_v9  ;;  %v3529_v14 = vrot.slane %v3857_v5, %v3931_v6 }
  0x90   :  { %v3533_v15 = vrot.slane %v3857_v5, %v3933_v7  ;;  %v3541_v19 = vrot.slane %v3857_v5, %v3937_v9 }
  0x91   :  { %114 = vrot.lane.b32.xlu0 %v104_v1, %s3879_s12  ;;  %716 = vrot.lane.b32.xlu1 %v706_v0, %s3882_s15  ;;  %v3316_v0 = vrot.slane %v3853_v63, %v3931_v6  ;;  %v3320_v1 = vrot.slane %v3853_v63, %v3933_v7 }
  0x95   :  { %500 = vrot.lane.b32.xlu0 %v490_v12, %s3881_s14  ;;  %118 = vrot.lane.b32.xlu1 %v105_v13, %s3879_s12 }
  0x99   :  { %292 = vrot.lane.b32.xlu0 %v67_v17, %s3880_s13  ;;  %504 = vrot.lane.b32.xlu1 %v491_v18, %s3881_s14  ;;  %v3537_v18 = vrot.slane %v3857_v5, %v3935_v8 }
  0x9d   :  { %720 = vrot.lane.b32.xlu0 %v707_v20, %s3882_s15  ;;  %290 = vrot.lane.b32.xlu1 %v286_v21, %s3880_s13 }
  0xa1   :  { %116 = vrot.lane.b32.xlu0 %v112_v22, %s3879_s12  ;;  %718 = vrot.lane.b32.xlu1 %v714_v23, %s3882_s15 }
  0xa5   :  { %502 = vrot.lane.b32.xlu0 %v498_v24, %s3881_s14  ;;  %1073 = vrot.lane.b32.xlu1 %v3999_v11, %s3878_s11 }
  0xa9   :  { %120 = vrot.lane.b32.xlu0 %v113_v25, %s3879_s12  ;;  %294 = vrot.lane.b32.xlu1 %v287_v26, %s3880_s13 }
  0xad   :  { %1071 = vrot.lane.b32.xlu0 %v3981_v55, %s3878_s11  ;;  %1274 = vrot.lane.b32.xlu1 %v3981_v55, %s3877_s10 }
  0xb1   :  { %506 = vrot.lane.b32.xlu0 %v499_v27, %s3881_s14  ;;  %722 = vrot.lane.b32.xlu1 %v715_v28, %s3882_s15 }
  0xb5   :  { %1075 = vrot.lane.b32.xlu0 %v3973_v41, %s3878_s11  ;;  %1278 = vrot.lane.b32.xlu1 %v3973_v41, %s3877_s10 }
  0xb9   :  { %1276 = vrot.lane.b32.xlu0 %v3999_v11, %s3877_s10  ;;  %1479 = vrot.lane.b32.xlu1 %v3999_v11, %s3875_s30 }
  0xbd   :  { %1477 = vrot.lane.b32.xlu0 %v3981_v55, %s3875_s30  ;;  %1680 = vrot.lane.b32.xlu1 %v3981_v55, %s3876_s7 }
  0xc1   :  { %1481 = vrot.lane.b32.xlu0 %v3973_v41, %s3875_s30  ;;  %1684 = vrot.lane.b32.xlu1 %v3973_v41, %s3876_s7 }
  0xc5   :  { %1682 = vrot.lane.b32.xlu0 %v3999_v11, %s3876_s7  ;;  %1948 = vrot.lane.b32.xlu1 %v1935_v31, %s3875_s30 }
  0xc9   :  { %1867 = vperm.xlu0 %3871, %v1864_v33   ;;  %1950 = vrot.lane.b32.xlu1 %v1939_v32, %s3875_s30  ;;  %v3760_v32 = vld [vmem:[%s4650_s2 + $0x8] sm:$0xff] }
  0xcd   :  { %1952 = vrot.lane.b32.xlu0 %v1943_v34, %s3875_s30  ;;  %1954 = vrot.lane.b32.xlu1 %v1947_v35, %s3875_s30 }
  0xd1   :  { %1908 = vrot.lane.b32.xlu0 %v1895_v37, %s3876_s7  ;;  %1910 = vrot.lane.b32.xlu1 %v1899_v38, %s3876_s7  ;;  %v69_v38 = vld [vmem:[%s4650_s2] sm:$0xff] }
  0xd5   :  { %1912 = vrot.lane.b32.xlu0 %v1903_v39, %s3876_s7  ;;  %1914 = vrot.lane.b32.xlu1 %v1907_v40, %s3876_s7  ;;  %v4169_v39 = vld [vmem:[%s4647_s1 + $0x14] sm:$0xf] }
  0xd6   :  { %v1070_v5 = vrot.slane %v4169_v39, %v3937_v9 }
  0xd9   :  { %2326 = vrot.lane.b32.xlu0 %v2313_v43, %s3877_s10  ;;  %2328 = vrot.lane.b32.xlu1 %v2317_v44, %s3877_s10  ;;  %v1058_v44 = vrot.slane %v4169_v39, %v3931_v6 }
  0xdd   :  { %2330 = vrot.lane.b32.xlu0 %v2321_v45, %s3877_s10  ;;  %2332 = vrot.lane.b32.xlu1 %v2325_v46, %s3877_s10 }
  0xe1   :  { %2539 = vrot.lane.b32.xlu0 %v2526_v48, %s3878_s11  ;;  %2541 = vrot.lane.b32.xlu1 %v2530_v49, %s3878_s11  ;;  %v1062_v48 = vrot.slane %v4169_v39, %v3933_v7  ;;  %v3774_v49 = vld [vmem:[%s4650_s2 + $0x10] sm:$0xff] }
  0xe5   :  { %2543 = vrot.lane.b32.xlu0 %v2534_v50, %s3878_s11  ;;  %2545 = vrot.lane.b32.xlu1 %v2538_v51, %s3878_s11 }
  0xe9   :  { %2903 = vrot.lane.b32.xlu0 %v2890_v53, %s3882_s15  ;;  %2905 = vrot.lane.b32.xlu1 %v2894_v54, %s3882_s15 }
  0xed   :  { %2907 = vrot.lane.b32.xlu0 %v2898_v56, %s3882_s15  ;;  %2909 = vrot.lane.b32.xlu1 %v2902_v57, %s3882_s15  ;;  %v1086_v57 = vcombine.low %v1058_v44, %v1062_v48 }
  0xf1   :  { %3116 = vrot.lane.b32.xlu0 %v3103_v59, %s3881_s14  ;;  %3118 = vrot.lane.b32.xlu1 %v3107_v60, %s3881_s14  ;;  %v3782_v59 = vld [vmem:[%s4650_s2 + $0x18] sm:$0xff] }
  0xf5   :  { %3120 = vrot.lane.b32.xlu0 %v3111_v61, %s3881_s14  ;;  %3122 = vrot.lane.b32.xlu1 %v3115_v62, %s3881_s14  ;;  %v893_v61 = vcombine.high %v3981_v55, %v3981_v55 }
  0xf7   :  { %v123_v2 = vpop.permute.xlu1 %122  ;;  %v297_v12 = vpop.permute.xlu0 %296 }
  0xf9   :  { %3329 = vrot.lane.b32.xlu0 %v3316_v0, %s3879_s12  ;;  %3331 = vrot.lane.b32.xlu1 %v3320_v1, %s3879_s12  ;;  %v1066_v1 = vrot.slane %v4169_v39, %v3935_v8 }
  0xfb   :  { %v4128_v13 = vpop.permute.xlu1 %508 }
  0xfd   :  { %3333 = vrot.lane.b32.xlu0 %v3324_v3, %s3879_s12  ;;  %3335 = vrot.lane.b32.xlu1 %v3328_v4, %s3879_s12 }
  0xff   :  { %v4134_v16 = vpop.permute.xlu0 %724  ;;  %v289_v17 = vpop.permute.xlu1 %288 }
 0x101   :  { %3542 = vrot.lane.b32.xlu0 %v3529_v14, %s3880_s13  ;;  %3544 = vrot.lane.b32.xlu1 %v3533_v15, %s3880_s13 }
 0x103   :  { %v115_v20 = vpop.permute.xlu0 %114  ;;  %v717_v21 = vpop.permute.xlu1 %716 }
 0x105   :  { %3546 = vrot.lane.b32.xlu0 %v3537_v18, %s3880_s13  ;;  %3548 = vrot.lane.b32.xlu1 %v3541_v19, %s3880_s13 }
 0x107   :  { %v501_v22 = vpop.permute.xlu0 %500  ;;  %v119_v23 = vpop.permute.xlu1 %118 }
 0x10b   :  { %v293_v24 = vpop.permute.xlu0 %292  ;;  %v4142_v25 = vpop.permute.xlu1 %504 }
 0x10f   :  { %v4144_v26 = vpop.permute.xlu0 %720  ;;  %v291_v27 = vpop.permute.xlu1 %290 }
 0x110   :  { %v300_v33 = vsel %vm298_vm6, %v291_v27, %v293_v24  ;;  %v299_v34 = vsel %vm298_vm6, %v289_v17, %v291_v27 }
 0x113   :  { %v117_v28 = vpop.permute.xlu0 %116  ;;  %v719_v29 = vpop.permute.xlu1 %718 }
 0x114   :  { %v126_v30 = vsel %vm124_vm5, %v117_v28, %v119_v23  ;;  %v125_v31 = vsel %vm124_vm5, %v115_v20, %v117_v28  ;;  %v728_v45 = vsel %vm726_vm9, %v719_v29, %v4144_v26  ;;  %v727_v56 = vsel %vm726_vm9, %v717_v21, %v719_v29 }
 0x115   :  { %3761 = vmatprep.subr.msk.mxu0 %vm60_vm3, %v126_v30 }
 0x116   :  { %3762 = vmatpush1.msk.msra.mxu0 %vm60_vm3, %v125_v31 }
 0x117   :  { %v503_v35 = vpop.permute.xlu0 %502  ;;  %3763 = vmatmul.mubr.msk.f32.vlgmr.msra.gmra.mxu0 %vm129_vm7, %v3760_v32  ;;  %3767 = vmatprep.subr.msk.mxu0 %vm60_vm3, %v300_v33  ;;  %v4157_v36 = vpop.permute.xlu1 %1073 }
 0x118   :  { %v512_v37 = vsel %vm510_vm8, %v503_v35, %v4142_v25  ;;  %3768 = vmatpush1.msk.msra.mxu0 %vm60_vm3, %v299_v34  ;;  %378 = vmatprep.mubr.f32.mxu0 %v3874_v10  ;;  %v511_v40 = vsel %vm510_vm8, %v501_v22, %v503_v35  ;;  %v1078_v50 = vrot.slane %v4157_v36, 4 }
 0x119   :  { %3775 = vmatprep.subr.msk.mxu0 %vm60_vm3, %v512_v37 }
 0x11b   :  { %v121_v42 = vpop.permute.xlu0 %120  ;;  %3769 = vmatmul.mubr.msk.f32.vlgmr.msra.gmra.mxu0 %vm129_vm7, %v69_v38  ;;  %v295_v43 = vpop.permute.xlu1 %294 }
 0x11c   :  { %3776 = vmatpush1.msk.msra.mxu0 %vm60_vm3, %v511_v40  ;;  %v128_v46 = vsel %vm124_vm5, %v121_v42, %v123_v2  ;;  %v127_v47 = vsel %vm124_vm5, %v119_v23, %v121_v42  ;;  %v302_v51 = vsel %vm298_vm6, %v295_v43, %v297_v12  ;;  %590 = vmatprep.mubr.f32.mxu0 %v3874_v10  ;;  %v3804_v2 = vld [vmem:[%s4647_s1 + $0x18] sm:$0xf]  ;;  %v3789_v12 = vld [vmem:[%s4650_s2 + $0x20] sm:$0xff] }
 0x11d   :  { %3783 = vmatprep.subr.msk.mxu0 %vm60_vm3, %v728_v45  ;;  %3764 = vmatprep.subr.msk.mxu1 %vm60_vm3, %v128_v46  ;;  %v301_v52 = vsel %vm298_vm6, %v293_v24, %v295_v43  ;;  %v1265_v15 = vrot.slane %v3804_v2, %v3933_v7  ;;  %v1269_v19 = vrot.slane %v3804_v2, %v3935_v8 }
 0x11e   :  { %3765 = vmatpush1.msk.msra.mxu1 %vm60_vm3, %v127_v47  ;;  %v1273_v20 = vrot.slane %v3804_v2, %v3937_v9  ;;  %v1087_v23 = vcombine.low %v1066_v1, %v1070_v5 }
 0x11f   :  { %v1072_v53 = vpop.permute.xlu0 %1071  ;;  %3766 = vmatmul.mubr.msk.f32.vlgmr.msra.gmra.mxu1 %vm129_vm7, %v3760_v32  ;;  %3770 = vmatprep.subr.msk.mxu1 %vm60_vm3, %v302_v51  ;;  %v4195_v54 = vpop.permute.xlu1 %1274 }
 0x120   :  { %v1077_v58 = vrot.slane %v1072_v53, 4  ;;  %3777 = vmatmul.mubr.msk.f32.vlgmr.msra.gmra.mxu0 %vm129_vm7, %v3774_v49  ;;  %3771 = vmatpush1.msk.msra.mxu1 %vm60_vm3, %v301_v52  ;;  %v1290_v32 = vcombine.low %v1269_v19, %v1273_v20  ;;  %v3820_v52 = vld [vmem:[%s4647_s1 + $0x20] sm:$0xf] }
 0x121   :  { %3784 = vmatpush1.msk.msra.mxu0 %vm60_vm3, %v727_v56  ;;  %449 = vmatprep.mubr.f32.mxu1 %v3874_v10 }
 0x122   :  { %v1080_v60 = vsel %vm60_vm3, %v1077_v58, %v1078_v50  ;;  %806 = vmatprep.mubr.f32.mxu0 %v3874_v10  ;;  %3790 = vmatprep.subr.msk.mxu0 %vm60_vm3, %v3999_v11 }
 0x123   :  { %v1081_v62 = vsel %vm699_vm2, %v1080_v60, %v4157_v36  ;;  %v507_v63 = vpop.permute.xlu0 %506  ;;  %3772 = vmatmul.mubr.msk.f32.vlgmr.msra.gmra.mxu1 %vm129_vm7, %v69_v38  ;;  %v723_v0 = vpop.permute.xlu1 %722  ;;  %v3805_v60 = vld [vmem:[%s4650_s2 + $0x30] sm:$0xff] }
 0x124   :  { %v1090_v3 = vmul.f32 %v1086_v57, %v1081_v62  ;;  %v513_v4 = vsel %vm510_vm8, %v4142_v25, %v507_v63  ;;  %v514_v55 = vsel %vm510_vm8, %v507_v63, %v4128_v13  ;;  %3785 = vmatmul.mubr.msk.f32.vlgmr.msra.gmra.mxu0 %vm129_vm7, %v3782_v59  ;;  %661 = vmatprep.mubr.f32.mxu1 %v3874_v10  ;;  %v3797_v25 = vld [vmem:[%s4650_s2 + $0x28] sm:$0xff] }
 0x125   :  { %3778 = vmatprep.subr.msk.mxu1 %vm60_vm3, %v514_v55  ;;  %3791 = vmatpush1.msk.msra.mxu0 %vm60_vm3, %v893_v61  ;;  %v1261_v13 = vrot.slane %v3804_v2, %v3931_v6  ;;  %v730_v17 = vsel %vm726_vm9, %v723_v0, %v4134_v16  ;;  %v729_v22 = vsel %vm726_vm9, %v4144_v26, %v723_v0  ;;  %v3812_v16 = vld [vmem:[%s4647_s1 + $0x1c] sm:$0xf] }
 0x126   :  { %3779 = vmatpush1.msk.msra.mxu1 %vm60_vm3, %v513_v4  ;;  %v1096_v14 = vcombine.high %v1090_v3, %v1090_v3  ;;  %970 = vmatprep.mubr.f32.mxu0 %v3874_v10  ;;  %v894_v26 = vcombine.high %v3999_v11, %v3999_v11  ;;  %v1464_v33 = vrot.slane %v3812_v16, %v3931_v6  ;;  %v1280_v11 = vrot.slane %v4195_v54, 4 }
 0x127   :  { %v1076_v18 = vpop.permute.xlu0 %1075  ;;  %3780 = vmatmul.mubr.msk.f32.vlgmr.msra.gmra.mxu1 %vm129_vm7, %v3774_v49  ;;  %v1279_v21 = vpop.permute.xlu1 %1278  ;;  %3786 = vmatprep.subr.msk.mxu1 %vm60_vm3, %v730_v17  ;;  %v1289_v28 = vcombine.low %v1261_v13, %v1265_v15  ;;  %v1468_v37 = vrot.slane %v3812_v16, %v3933_v7  ;;  %v1476_v46 = vrot.slane %v3812_v16, %v3937_v9 }
 0x128   :  { %v1079_v24 = vrot.slane %v1076_v18, 4  ;;  %3792 = vmatmul.mubr.msk.f32.vlgmr.msra.gmra.mxu0 %vm129_vm7, %v3789_v12  ;;  %3787 = vmatpush1.msk.msra.mxu1 %vm60_vm3, %v729_v22  ;;  %v1282_v29 = vrot.slane %v1279_v21, 4  ;;  %v1667_v61 = vrot.slane %v3820_v52, %v3931_v6  ;;  %v1671_v62 = vrot.slane %v3820_v52, %v3933_v7 }
 0x129   :  { %3798 = vmatprep.subr.msk.mxu0 %vm60_vm3, %v1096_v14  ;;  %877 = vmatprep.mubr.f32.mxu1 %v3874_v10  ;;  %v1492_v51 = vcombine.low %v1464_v33, %v1468_v37  ;;  %v1675_v2 = vrot.slane %v3820_v52, %v3935_v8 }
 0x12a   :  { %v1082_v27 = vsel %vm60_vm3, %v1078_v50, %v1079_v24  ;;  %3799 = vmatpush1.msk.msra.mxu0 %vm60_vm3, %v1090_v3  ;;  %1173 = vmatprep.mubr.f32.mxu0 %v3874_v10  ;;  %v1679_v3 = vrot.slane %v3820_v52, %v3937_v9 }
 0x12b   :  { %v1083_v30 = vsel %vm699_vm2, %v1082_v27, %v1076_v18  ;;  %v1277_v31 = vpop.permute.xlu0 %1276  ;;  %3788 = vmatmul.mubr.msk.f32.vlgmr.msra.gmra.mxu1 %vm129_vm7, %v3782_v59  ;;  %v1480_v34 = vpop.permute.xlu1 %1479  ;;  %3793 = vmatprep.subr.msk.mxu1 %vm60_vm3, %v3973_v41  ;;  %v1472_v41 = vrot.slane %v3812_v16, %v3935_v8  ;;  %v3813_v8 = vld [vmem:[%s4650_s2 + $0x38] sm:$0xff] }
 0x12c   :  { %v1091_v35 = vmul.f32 %v1087_v23, %v1083_v30  ;;  %v1281_v36 = vrot.slane %v1277_v31, 4  ;;  %3800 = vmatmul.mubr.msk.f32.vlgmr.msra.gmra.mxu0 %vm129_vm7, %v3797_v25  ;;  %3794 = vmatpush1.msk.msra.mxu1 %vm60_vm3, %v894_v26  ;;  %v1484_v42 = vrot.slane %v1480_v34, 4  ;;  %v1696_v17 = vcombine.low %v1675_v2, %v1679_v3 }
 0x12d   :  { %1041 = vmatprep.mubr.f32.mxu1 %v3874_v10  ;;  %1376 = vmatprep.mubr.f32.mxu0 %v3874_v10  ;;  %v1493_v58 = vcombine.low %v1472_v41, %v1476_v46 }
 0x12e   :  { %v1097_v38 = vcombine.high %v1091_v35, %v1091_v35  ;;  %v1283_v39 = vsel %vm60_vm3, %v1280_v11, %v1281_v36  ;;  %v1285_v40 = vsel %vm60_vm3, %v1281_v36, %v1282_v29  ;;  %v3821_v29 = vld [vmem:[%s4650_s2 + $0x40] sm:$0xff] }
 0x12f   :  { %v1284_v43 = vsel %vm483_vm4, %v1283_v39, %v1277_v31  ;;  %v1286_v44 = vsel %vm483_vm4, %v1285_v40, %v1279_v21  ;;  %v1478_v45 = vpop.permute.xlu0 %1477  ;;  %3795 = vmatmul.mubr.msk.f32.vlgmr.msra.gmra.mxu1 %vm129_vm7, %v3789_v12  ;;  %v1681_v47 = vpop.permute.xlu1 %1680  ;;  %v1695_v12 = vcombine.low %v1667_v61, %v1671_v62 }
 0x130   :  { %v1293_v48 = vmul.f32 %v1289_v28, %v1284_v43  ;;  %v1294_v49 = vmul.f32 %v1290_v32, %v1286_v44  ;;  %v1483_v50 = vrot.slane %v1478_v45, 4  ;;  %3801 = vmatprep.subr.msk.mxu1 %vm60_vm3, %v1097_v38  ;;  %1244 = vmatprep.mubr.f32.mxu1 %v3874_v10  ;;  %v1686_v55 = vrot.slane %v1681_v47, 4 }
 0x131   :  { %3802 = vmatpush1.msk.msra.mxu1 %vm60_vm3, %v1091_v35 }
 0x132   :  { %v1299_v53 = vcombine.high %v1293_v48, %v1293_v48  ;;  %v1300_v54 = vcombine.high %v1294_v49, %v1294_v49  ;;  %v1486_v56 = vsel %vm60_vm3, %v1483_v50, %v1484_v42 }
 0x133   :  { %v1487_v57 = vsel %vm97_vm1, %v1486_v56, %v1480_v34  ;;  %v1482_v59 = vpop.permute.xlu0 %1481  ;;  %3803 = vmatmul.mubr.msk.f32.vlgmr.msra.gmra.mxu1 %vm129_vm7, %v3797_v25  ;;  %v1685_v63 = vpop.permute.xlu1 %1684 }
 0x134   :  { %v1496_v0 = vmul.f32 %v1492_v51, %v1487_v57  ;;  %v1485_v1 = vrot.slane %v1482_v59, 4  ;;  %3806 = vmatprep.subr.msk.mxu0 %vm60_vm3, %v1299_v53  ;;  %3809 = vmatprep.subr.msk.mxu1 %vm60_vm3, %v1300_v54  ;;  %v1688_v7 = vrot.slane %v1685_v63, 4 }
 0x135   :  { %3807 = vmatpush1.msk.msra.mxu0 %vm60_vm3, %v1293_v48  ;;  %3810 = vmatpush1.msk.msra.mxu1 %vm60_vm3, %v1294_v49 }
 0x136   :  { %v1502_v4 = vcombine.high %v1496_v0, %v1496_v0  ;;  %v1488_v6 = vsel %vm60_vm3, %v1484_v42, %v1485_v1  ;;  %3808 = vmatmul.mubr.msk.f32.vlgmr.msra.gmra.mxu0 %vm129_vm7, %v3805_v60  ;;  %1447 = vmatprep.mubr.f32.mxu1 %v3874_v10 }
 0x137   :  { %v1489_v5 = vsel %vm97_vm1, %v1488_v6, %v1482_v59  ;;  %v1683_v14 = vpop.permute.xlu0 %1682  ;;  %3811 = vmatmul.mubr.msk.f32.vlgmr.msra.gmra.mxu1 %vm129_vm7, %v3805_v60  ;;  %1579 = vmatprep.mubr.f32.mxu0 %v3874_v10  ;;  %v1949_v9 = vpop.permute.xlu1 %1948 }
 0x138   :  { %v1497_v13 = vmul.f32 %v1493_v58, %v1489_v5  ;;  %v1687_v15 = vrot.slane %v1683_v14, 4  ;;  %3814 = vmatprep.subr.msk.mxu0 %vm60_vm3, %v1502_v4  ;;  %1650 = vmatprep.mubr.f32.mxu1 %v3874_v10  ;;  %v1964_v18 = vmul.f32 0.0, %v1949_v9 }
 0x139   :  { %3815 = vmatpush1.msk.msra.mxu0 %vm60_vm3, %v1496_v0 }
 0x13a   :  { %v1503_v19 = vcombine.high %v1497_v13, %v1497_v13  ;;  %v1689_v20 = vsel %vm60_vm3, %v1686_v55, %v1687_v15  ;;  %v1691_v21 = vsel %vm60_vm3, %v1687_v15, %v1688_v7  ;;  %3816 = vmatmul.mubr.msk.f32.vlgmr.msra.gmra.mxu0 %vm129_vm7, %v3813_v8  ;;  %1976 = vrot.lane.b32.xlu0 %v1964_v18, %s3879_s12 }
 0x13b   :  { %v1690_v22 = vsel %vm58_vm0, %v1689_v20, %v1683_v14  ;;  %v1692_v23 = vsel %vm58_vm0, %v1691_v21, %v1685_v63  ;;  %1782 = vmatprep.mubr.f32.mxu0 %v3874_v10  ;;  %v1951_v24 = vpop.permute.xlu1 %1950 }
 0x13c   :  { %v1699_v16 = vmul.f32 %v1695_v12, %v1690_v22  ;;  %v1700_v25 = vmul.f32 %v1696_v17, %v1692_v23  ;;  %3817 = vmatprep.subr.msk.mxu1 %vm60_vm3, %v1503_v19  ;;  %v4318_v26 = vsel %vm97_vm1, %v1949_v9, %v1951_v24 }
 0x13d   :  { %3818 = vmatpush1.msk.msra.mxu1 %vm60_vm3, %v1497_v13 }
 0x13e   :  { %v1705_v27 = vcombine.high %v1699_v16, %v1699_v16  ;;  %v1706_v28 = vcombine.high %v1700_v25, %v1700_v25  ;;  %3819 = vmatmul.mubr.msk.f32.vlgmr.msra.gmra.mxu1 %vm129_vm7, %v3813_v8 }
 0x13f   :  { %1853 = vmatprep.mubr.f32.mxu1 %v3874_v10  ;;  %v4336_v31 = vpop.permute.xlu1 %1954 }
 0x140   :  { %3822 = vmatprep.subr.msk.mxu0 %vm60_vm3, %v1705_v27  ;;  %3825 = vmatprep.subr.msk.mxu1 %vm60_vm3, %v1706_v28 }
 0x141   :  { %3823 = vmatpush1.msk.msra.mxu0 %vm60_vm3, %v1699_v16  ;;  %3826 = vmatpush1.msk.msra.mxu1 %vm60_vm3, %v1700_v25 }
 0x142   :  { %3824 = vmatmul.mubr.msk.f32.vlgmr.msra.gmra.mxu0 %vm129_vm7, %v3821_v29  ;;  %3827 = vmatmul.mubr.msk.f32.vlgmr.msra.gmra.mxu1 %vm129_vm7, %v3821_v29 }
 0x143   :  { %2062 = vmatprep.mubr.f32.mxu0 %v3874_v10  ;;  %2133 = vmatprep.mubr.f32.mxu1 %v3874_v10  ;;  %v1911_v11 = vpop.permute.xlu1 %1910 }
 0x144   :  { %v4334_v30 = vpop.permute.xlu0 %1867 }
 0x147   :  { %v4354_v39 = vpop.permute.xlu1 %1914 }
 0x148   :  { %v4338_v32 = vpop.permute.xlu0 %1952 }
 0x149   :  { %v4342_v33 = vsel %vm97_vm1, %v1951_v24, %v4338_v32 }
 0x14b   :  { %v2329_v43 = vpop.permute.xlu1 %2328 }
 0x14c   :  { %v1909_v34 = vpop.permute.xlu0 %1908 }
 0x14d   :  { %v1924_v35 = vmul.f32 0.0, %v1909_v34  ;;  %v4345_v36 = vsel %vm58_vm0, %v1909_v34, %v1911_v11 }
 0x14f   :  { %2145 = vrot.lane.b32.xlu1 %v1924_v35, %s3880_s13  ;;  %v4366_v46 = vpop.permute.xlu1 %2332 }
 0x150   :  { %v4348_v37 = vpop.permute.xlu0 %1912 }
 0x151   :  { %v4352_v38 = vsel %vm58_vm0, %v1911_v11, %v4348_v37 }
 0x153   :  { %v4369_v49 = vpop.permute.xlu1 %2541 }
 0x154   :  { %v2327_v40 = vpop.permute.xlu0 %2326 }
 0x155   :  { %v2342_v42 = vmul.f32 0.0, %v2327_v40  ;;  %v4360_v45 = vsel %vm483_vm4, %v2327_v40, %v2329_v43 }
 0x157   :  { %2354 = vrot.lane.b32.xlu0 %v2342_v42, %s3881_s14  ;;  %v4375_v51 = vpop.permute.xlu1 %2545 }
 0x158   :  { %v4357_v44 = vpop.permute.xlu0 %2330 }
 0x159   :  { %v4364_v41 = vsel %vm483_vm4, %v2329_v43, %v4357_v44 }
 0x15b   :  { %v4377_v52 = vpop.permute.xlu1 %2905 }
 0x15c   :  { %v2540_v47 = vpop.permute.xlu0 %2539 }
 0x15d   :  { %v2555_v48 = vmul.f32 0.0, %v2540_v47  ;;  %v4373_v50 = vsel %vm699_vm2, %v2540_v47, %v4369_v49 }
 0x15f   :  { %2567 = vrot.lane.b32.xlu1 %v2555_v48, %s3882_s15  ;;  %v4379_v53 = vpop.permute.xlu1 %2909 }
 0x160   :  { %v2923_v54 = vmul.f32 0.0, %v4379_v53 }
 0x163   :  { %2939 = vrot.lane.b32.xlu1 %v2923_v54, %s3878_s11 }
 0x1d7   :  { %v207_v56 = vpop.f32.mrf.mxu0 }
 0x1d9   :  { %v209_v57 = vpop.f32.mrf.mxu0 }
 0x1db   :  { %v380_v58 = vpop.f32.mrf.mxu0 }
 0x1dc   :  { %v381_v12 = vadd.f32 %v380_v58, %v207_v56 }
 0x1dd   :  { %v382_v59 = vpop.f32.mrf.mxu0 }
 0x1de   :  { %v383_v35 = vadd.f32 %v382_v59, %v209_v57 }
 0x1df   :  { %v278_v60 = vpop.f32.mrf.mxu1 }
 0x1e0   :  { %v592_v61 = vpop.f32.mrf.mxu0 }
 0x1e1   :  { %v280_v62 = vpop.f32.mrf.mxu1  ;;  %v668_v15 = vadd.f32 %v592_v61, %v381_v12 }
 0x1e2   :  { %v594_v63 = vpop.f32.mrf.mxu0 }
 0x1e3   :  { %v451_v0 = vpop.f32.mrf.mxu1  ;;  %v669_v58 = vadd.f32 %v594_v63, %v383_v35 }
 0x1e4   :  { %v808_v1 = vpop.f32.mrf.mxu0  ;;  %v452_v8 = vadd.f32 %v451_v0, %v278_v60 }
 0x1e5   :  { %v453_v2 = vpop.f32.mrf.mxu1  ;;  %v884_v21 = vadd.f32 %v808_v1, %v668_v15 }
 0x1e6   :  { %v810_v3 = vpop.f32.mrf.mxu0  ;;  %v454_v54 = vadd.f32 %v453_v2, %v280_v62  ;;  %v2544_v2 = vpop.permute.xlu0 %2543 }
 0x1e7   :  { %v663_v4 = vpop.f32.mrf.mxu1  ;;  %v885_v12 = vadd.f32 %v810_v3, %v669_v58 }
 0x1e8   :  { %v972_v6 = vpop.f32.mrf.mxu0  ;;  %v670_v18 = vadd.f32 %v663_v4, %v452_v8 }
 0x1e9   :  { %v665_v55 = vpop.f32.mrf.mxu1  ;;  %v1048_v27 = vadd.f32 %v972_v6, %v884_v21 }
 0x1ea   :  { %v974_v5 = vpop.f32.mrf.mxu0 }
 0x1eb   :  { %v879_v7 = vpop.f32.mrf.mxu1  ;;  %v1049_v59 = vadd.f32 %v974_v5, %v885_v12 }
 0x1ec   :  { %v1175_v13 = vpop.f32.mrf.mxu0  ;;  %v886_v23 = vadd.f32 %v879_v7, %v670_v18  ;;  %v671_v7 = vadd.f32 %v665_v55, %v454_v54  ;;  %v2548_v54 = vsel %vm699_vm2, %v4369_v49, %v2544_v2 }
 0x1ed   :  { %v881_v14 = vpop.f32.mrf.mxu1  ;;  %v1251_v11 = vadd.f32 %v1175_v13, %v1048_v27 }
 0x1ee   :  { %v1177_v20 = vpop.f32.mrf.mxu0  ;;  %v887_v57 = vadd.f32 %v881_v14, %v671_v7 }
 0x1ef   :  { %v1043_v9 = vpop.f32.mrf.mxu1  ;;  %v1252_v15 = vadd.f32 %v1177_v20, %v1049_v59 }
 0x1f0   :  { %v1050_v28 = vadd.f32 %v1043_v9, %v886_v23 }
 0x1f1   :  { %v1045_v17 = vpop.f32.mrf.mxu1 }
 0x1f2   :  { %v1051_v3 = vadd.f32 %v1045_v17, %v887_v57  ;;  %v2904_v17 = vpop.permute.xlu0 %2903 }
 0x1f3   :  { %v1246_v19 = vpop.f32.mrf.mxu1 }
 0x1f4   :  { %v1253_v40 = vadd.f32 %v1246_v19, %v1050_v28 }
 0x1f5   :  { %v1248_v22 = vpop.f32.mrf.mxu1 }
 0x1f6   :  { %v1378_v24 = vpop.f32.mrf.mxu0  ;;  %v1254_v20 = vadd.f32 %v1248_v22, %v1051_v3  ;;  %v4416_v28 = vpop.permute.xlu0 %2907 }
 0x1f7   :  { %v1449_v16 = vpop.f32.mrf.mxu1  ;;  %v1454_v43 = vadd.f32 %v1378_v24, %v1251_v11  ;;  %v2549_v24 = vsel %vm699_vm2, %v2544_v2, %v4375_v51 }
 0x1f8   :  { %v1380_v25 = vpop.f32.mrf.mxu0  ;;  %v1456_v60 = vadd.f32 %v1449_v16, %v1253_v40 }
 0x1f9   :  { %v1451_v29 = vpop.f32.mrf.mxu1  ;;  %v1455_v55 = vadd.f32 %v1380_v25, %v1252_v15 }
 0x1fa   :  { %v1581_v34 = vpop.f32.mrf.mxu0  ;;  %v1457_v16 = vadd.f32 %v1451_v29, %v1254_v20  ;;  %v2912_v29 = vsel %vm726_vm9, %v4377_v52, %v4416_v28 }
 0x1fb   :  { %v1657_v56 = vadd.f32 %v1581_v34, %v1454_v43 }
 0x1fc   :  { %v1583_v47 = vpop.f32.mrf.mxu0 }
 0x1fd   :  { %v1658_v19 = vadd.f32 %v1583_v47, %v1455_v55 }
 0x1fe   :  { %v1652_v42 = vpop.f32.mrf.mxu1 }
 0x1ff   :  { %v1659_v4 = vadd.f32 %v1652_v42, %v1456_v60 }
 0x200   :  { %v1654_v48 = vpop.f32.mrf.mxu1 }
 0x201   :  { %v1660_v34 = vadd.f32 %v1654_v48, %v1457_v16  ;;  %v3117_v48 = vpop.permute.xlu0 %3116 }
 0x202   :  { %v1784_v61 = vpop.f32.mrf.mxu0  ;;  %v1855_v1 = vpop.f32.mrf.mxu1 }
 0x203   :  { %v1860_v0 = vadd.f32 %v1784_v61, %v1657_v56  ;;  %v1862_v8 = vadd.f32 %v1855_v1, %v1659_v4  ;;  %v3119_v56 = vpop.permute.xlu1 %3118 }
 0x204   :  { %v1857_v27 = vpop.f32.mrf.mxu1 }
 0x205   :  { %v1870_v6 = vadd.f32 %v4334_v30, %v1860_v0  ;;  %v1872_v13 = vadd.f32 %v4334_v30, %v1862_v8  ;;  %v1863_v35 = vadd.f32 %v1857_v27, %v1660_v34  ;;  %v3124_v0 = vsel %vm510_vm8, %v3117_v48, %v3119_v56 }
 0x207   :  { %v4384_v9 = vmax.f32 %v1870_v6, 0.0  ;;  %v4393_v18 = vmax.f32 %v1872_v13, 0.0  ;;  %v1873_v43 = vadd.f32 %v4334_v30, %v1863_v35  ;;  %v3123_v4 = vpop.permute.xlu1 %3122 }
 0x209   :  { %v1965_v62 = vmul.f32 %v4318_v26, %v4384_v9  ;;  %v1925_v63 = vmul.f32 %v4345_v36, %v4384_v9  ;;  %v2343_v5 = vmul.f32 %v4360_v45, %v4384_v9  ;;  %v2556_v14 = vmul.f32 %v4373_v50, %v4384_v9  ;;  %v1786_v26 = vpop.f32.mrf.mxu0 }
 0x20a   :  { %v1918_v36 = vsel %vm58_vm0, %v4348_v37, %v4354_v39  ;;  %v1861_v21 = vadd.f32 %v1786_v26, %v1658_v19  ;;  %v2919_v23 = vmul.f32 %v2904_v17, %v4384_v9  ;;  %v1958_v50 = vsel %vm97_vm1, %v4338_v32, %v4336_v31 }
 0x20b   :  { %1978 = vrot.lane.b32.xlu0 %v1965_v62, %s3879_s12  ;;  %2147 = vrot.lane.b32.xlu1 %v1925_v63, %s3880_s13  ;;  %v1927_v45 = vmul.f32 %v1918_v36, %v4393_v18  ;;  %v1967_v22 = vmul.f32 %v1958_v50, %v4393_v18  ;;  %v2558_v25 = vmul.f32 %v2549_v24, %v4393_v18  ;;  %v4441_v58 = vmax.f32 %v1873_v43, 0.0 }
 0x20c   :  { %v1871_v37 = vadd.f32 %v4334_v30, %v1861_v21  ;;  %v2336_v32 = vsel %vm483_vm4, %v4357_v44, %v4366_v46  ;;  %v2921_v42 = vmul.f32 %v2912_v29, %v4393_v18  ;;  %v3132_v57 = vmul.f32 %v3117_v48, %v4384_v9 }
 0x20d   :  { %v2345_v40 = vmul.f32 %v2336_v32, %v4393_v18  ;;  %v1968_v49 = vmul.f32 %v4336_v31, %v4441_v58  ;;  %v3332_v31 = vpop.permute.xlu1 %3331  ;;  %v2346_v12 = vmul.f32 %v4366_v46, %v4441_v58  ;;  %v1928_v59 = vmul.f32 %v4354_v39, %v4441_v58 }
 0x20e   :  { %v4426_v11 = vmax.f32 %v1871_v37, 0.0  ;;  %v2559_v55 = vmul.f32 %v4375_v51, %v4441_v58  ;;  %v2913_v19 = vsel %vm726_vm9, %v4416_v28, %v4379_v53 }
 0x20f   :  { %2356 = vrot.lane.b32.xlu0 %v2343_v5, %s3881_s14  ;;  %2569 = vrot.lane.b32.xlu1 %v2556_v14, %s3882_s15  ;;  %v2922_v21 = vmul.f32 %v2913_v19, %v4441_v58 }
 0x210   :  { %v1926_v44 = vmul.f32 %v4352_v38, %v4426_v11  ;;  %v1966_v47 = vmul.f32 %v4342_v33, %v4426_v11  ;;  %v2557_v60 = vmul.f32 %v2548_v54, %v4426_v11  ;;  %v2344_v30 = vmul.f32 %v4364_v41, %v4426_v11  ;;  %v3121_v38 = vpop.permute.xlu0 %3120 }
 0x211   :  { %v2911_v33 = vsel %vm726_vm9, %v2904_v17, %v4377_v52  ;;  %v3125_v1 = vsel %vm510_vm8, %v3119_v56, %v3121_v38  ;;  %v3133_v7 = vmul.f32 %v3124_v0, %v4426_v11  ;;  %v3136_v52 = vmul.f32 0.0, %v3123_v4  ;;  %v3336_v63 = vpop.permute.xlu1 %3335 }
 0x212   :  { %v2920_v61 = vmul.f32 %v2911_v33, %v4426_v11  ;;  %v3134_v41 = vmul.f32 %v3125_v1, %v4393_v18  ;;  %v3349_v15 = vmul.f32 0.0, %v3336_v63  ;;  %v3126_v5 = vsel %vm510_vm8, %v3121_v38, %v3123_v4 }
 0x213   :  { %2931 = vrot.lane.b32.xlu0 %v2919_v23, %s3878_s11  ;;  %2151 = vrot.lane.b32.xlu1 %v1927_v45, %s3880_s13  ;;  %v3135_v26 = vmul.f32 %v3126_v5, %v4441_v58 }
 0x214   :  { %v3330_v6 = vpop.permute.xlu0 %3329 }
 0x215   :  { %v3337_v13 = vsel %vm124_vm5, %v3330_v6, %v3332_v31  ;;  %v3545_v39 = vpop.permute.xlu1 %3544  ;;  %v3345_v14 = vmul.f32 %v3330_v6, %v4384_v9 }
 0x216   :  { %v3346_v2 = vmul.f32 %v3337_v13, %v4426_v11 }
 0x217   :  { %1982 = vrot.lane.b32.xlu0 %v1967_v22, %s3879_s12  ;;  %2573 = vrot.lane.b32.xlu1 %v2558_v25, %s3882_s15  ;;  %v3737_v25 = vld [vmem:[%s4651_s5] sm:$0xff] }
 0x218   :  { %v3334_v8 = vpop.permute.xlu0 %3333 }
 0x219   :  { %v3338_v62 = vsel %vm124_vm5, %v3332_v31, %v3334_v8  ;;  %v3549_v20 = vpop.permute.xlu1 %3548  ;;  %v3339_v24 = vsel %vm124_vm5, %v3334_v8, %v3336_v63 }
 0x21a   :  { %v3347_v46 = vmul.f32 %v3338_v62, %v4393_v18  ;;  %v3348_v37 = vmul.f32 %v3339_v24, %v4441_v58  ;;  %v3562_v22 = vmul.f32 0.0, %v3549_v20 }
 0x21b   :  { %2360 = vrot.lane.b32.xlu0 %v2345_v40, %s3881_s14  ;;  %2935 = vrot.lane.b32.xlu1 %v2921_v42, %s3878_s11 }
 0x21c   :  { %v3543_v3 = vpop.permute.xlu0 %3542 }
 0x21d   :  { %v3550_v36 = vsel %vm298_vm6, %v3543_v3, %v3545_v39  ;;  %v3558_v16 = vmul.f32 %v3543_v3, %v4384_v9  ;;  %v2146_v27 = vpop.permute.xlu1 %2145 }
 0x21e   :  { %v3559_v51 = vmul.f32 %v3550_v36, %v4426_v11  ;;  %v3846_v36 = vld [vmem:[%s4652_s4 + $0x28] sm:$0xff] }
 0x21f   :  { %2149 = vrot.lane.b32.xlu0 %v1926_v44, %s3880_s13  ;;  %1980 = vrot.lane.b32.xlu1 %v1966_v47, %s3879_s12 }
 0x220   :  { %v3547_v17 = vpop.permute.xlu0 %3546 }
 0x221   :  { %v3551_v23 = vsel %vm298_vm6, %v3545_v39, %v3547_v17  ;;  %v3552_v45 = vsel %vm298_vm6, %v3547_v17, %v3549_v20  ;;  %v2568_v28 = vpop.permute.xlu1 %2567 }
 0x222   :  { %v3560_v53 = vmul.f32 %v3551_v23, %v4393_v18  ;;  %v3561_v50 = vmul.f32 %v3552_v45, %v4441_v58 }
 0x223   :  { %2571 = vrot.lane.b32.xlu0 %v2557_v60, %s3882_s15  ;;  %2358 = vrot.lane.b32.xlu1 %v2344_v30, %s3881_s14 }
 0x224   :  { %v1977_v34 = vpop.permute.xlu0 %1976 }
 0x225   :  { %v4508_v32 = vpop.permute.xlu1 %2939 }
 0x227   :  { %2933 = vrot.lane.b32.xlu0 %v2920_v61, %s3878_s11  ;;  %1984 = vrot.lane.b32.xlu1 %v1968_v49, %s3879_s12  ;;  %v3829_v61 = vld [vmem:[%s4652_s4 + $0x8] sm:$0xff] }
 0x228   :  { %v2355_v29 = vpop.permute.xlu0 %2354 }
 0x22b   :  { %3148 = vrot.lane.b32.xlu0 %v3134_v41, %s3877_s10  ;;  %3146 = vrot.lane.b32.xlu1 %v3133_v7, %s3877_s10 }
 0x22f   :  { %2362 = vrot.lane.b32.xlu1 %v2346_v12, %s3881_s14  ;;  %3152 = vrot.lane.b32.xlu0 %v3136_v52, %s3877_s10  ;;  %v1929_v52 = vld [vmem:[%s4652_s4] sm:$0xff] }
 0x233   :  { %3144 = vrot.lane.b32.xlu1 %v3132_v57, %s3877_s10  ;;  %2153 = vrot.lane.b32.xlu0 %v1928_v59, %s3880_s13  ;;  %v3835_v59 = vld [vmem:[%s4652_s4 + $0x10] sm:$0xff] }
 0x237   :  { %3361 = vrot.lane.b32.xlu1 %v3347_v46, %s3875_s30  ;;  %3359 = vrot.lane.b32.xlu0 %v3346_v2, %s3875_s30  ;;  %v3839_v2 = vld [vmem:[%s4652_s4 + $0x18] sm:$0xff] }
 0x23b   :  { %2575 = vrot.lane.b32.xlu0 %v2559_v55, %s3882_s15  ;;  %3365 = vrot.lane.b32.xlu1 %v3349_v15, %s3875_s30  ;;  %v3842_v55 = vld [vmem:[%s4652_s4 + $0x20] sm:$0xff] }
 0x23f   :  { %3357 = vrot.lane.b32.xlu0 %v3345_v14, %s3875_s30  ;;  %3150 = vrot.lane.b32.xlu1 %v3135_v26, %s3877_s10 }
 0x243   :  { %2937 = vrot.lane.b32.xlu0 %v2922_v21, %s3878_s11  ;;  %3572 = vrot.lane.b32.xlu1 %v3559_v51, %s3876_s7 }
 0x247   :  { %3574 = vrot.lane.b32.xlu0 %v3560_v53, %s3876_s7  ;;  %3576 = vrot.lane.b32.xlu1 %v3561_v50, %s3876_s7  ;;  %v3850_v53 = vld [vmem:[%s4652_s4 + $0x30] sm:$0xff] }
 0x24b   :  { %3363 = vrot.lane.b32.xlu0 %v3348_v37, %s3875_s30  ;;  %3570 = vrot.lane.b32.xlu1 %v3558_v16, %s3876_s7 }
 0x24f   :  { %3578 = vrot.lane.b32.xlu0 %v3562_v22, %s3876_s7 }
 0x253   :  { %3740 = vperm.xlu0 %3871, %v3737_v25  }
 0x27d   :  { %v1979_v35 = vpop.permute.xlu0 %1978  ;;  %v2148_v40 = vpop.permute.xlu1 %2147 }
 0x27e   :  { %v1986_v49 = vsel %vm124_vm5, %v1977_v34, %v1979_v35  ;;  %v2155_v1 = vsel %vm298_vm6, %v2146_v27, %v2148_v40  ;;  %v3854_v27 = vld [vmem:[%s4652_s4 + $0x38] sm:$0xff] }
 0x281   :  { %v2357_v42 = vpop.permute.xlu0 %2356  ;;  %v2570_v43 = vpop.permute.xlu1 %2569 }
 0x282   :  { %v2364_v6 = vsel %vm510_vm8, %v2355_v29, %v2357_v42  ;;  %v2577_v62 = vsel %vm726_vm9, %v2568_v28, %v2570_v43 }
 0x285   :  { %v2932_v44 = vpop.permute.xlu0 %2931  ;;  %v4510_v47 = vpop.permute.xlu1 %2151 }
 0x289   :  { %v1983_v48 = vpop.permute.xlu0 %1982  ;;  %v4512_v54 = vpop.permute.xlu1 %2573 }
 0x28d   :  { %v4514_v56 = vpop.permute.xlu0 %2360  ;;  %v4516_v60 = vpop.permute.xlu1 %2935 }
 0x291   :  { %v2150_v30 = vpop.permute.xlu0 %2149  ;;  %v1981_v33 = vpop.permute.xlu1 %1980 }
 0x292   :  { %v1987_v38 = vsel %vm124_vm5, %v1979_v35, %v1981_v33  ;;  %v2156_v0 = vsel %vm298_vm6, %v2148_v40, %v2150_v30  ;;  %v1988_v13 = vsel %vm124_vm5, %v1981_v33, %v1983_v48  ;;  %v2157_v19 = vsel %vm298_vm6, %v2150_v30, %v4510_v47 }
 0x293   :  { %2028 = vmatprep.subr.mxu0 %v1987_v38 }
 0x294   :  { %2029 = vmatpush1.msra.mxu0 %v1986_v49 }
 0x295   :  { %v4525_v4 = vpop.permute.xlu0 %2571  ;;  %3830 = vmatmul.mubr.msk.f32.vlgmr.msra.gmra.mxu0 %vm1994_vm10, %v3829_v61  ;;  %2196 = vmatprep.subr.mxu0 %v2156_v0  ;;  %v2359_v41 = vpop.permute.xlu1 %2358 }
 0x296   :  { %2197 = vmatpush1.msra.mxu0 %v2155_v1  ;;  %v2365_v7 = vsel %vm510_vm8, %v2357_v42, %v2359_v41  ;;  %2230 = vmatprep.mubr.f32.mxu0 %v3874_v10  ;;  %v2578_v8 = vsel %vm726_vm9, %v2570_v43, %v4525_v4  ;;  %v2366_v20 = vsel %vm510_vm8, %v2359_v41, %v4514_v56 }
 0x297   :  { %2405 = vmatprep.subr.mxu0 %v2365_v7  ;;  %v2579_v37 = vsel %vm726_vm9, %v4525_v4, %v4512_v54 }
 0x299   :  { %v2934_v31 = vpop.permute.xlu0 %2933  ;;  %3832 = vmatmul.mubr.msk.f32.vlgmr.msra.gmra.mxu0 %vm1994_vm10, %v1929_v52  ;;  %v1985_v12 = vpop.permute.xlu1 %1984 }
 0x29a   :  { %2406 = vmatpush1.msra.mxu0 %v2364_v6  ;;  %v1989_v57 = vsel %vm124_vm5, %v1983_v48, %v1985_v12  ;;  %2439 = vmatprep.mubr.f32.mxu0 %v3874_v10  ;;  %v2942_v39 = vsel %vm699_vm2, %v2934_v31, %v4516_v60  ;;  %v3858_v48 = vld [vmem:[%s4652_s4 + $0x40] sm:$0xff] }
 0x29b   :  { %2618 = vmatprep.subr.mxu0 %v2578_v8  ;;  %2099 = vmatprep.subr.mxu1 %v1989_v57 }
 0x29c   :  { %2100 = vmatpush1.msra.mxu1 %v1988_v13 }
 0x29d   :  { %v4544_v63 = vpop.permute.xlu0 %3148  ;;  %3836 = vmatmul.mubr.msk.f32.vlgmr.msra.gmra.mxu0 %vm1994_vm10, %v3835_v59  ;;  %v3147_v46 = vpop.permute.xlu1 %3146  ;;  %3831 = vmatmul.mubr.msk.f32.vlgmr.msra.gmra.mxu1 %vm1994_vm10, %v3829_v61 }
 0x29e   :  { %2619 = vmatpush1.msra.mxu0 %v2577_v62  ;;  %2652 = vmatprep.mubr.f32.mxu0 %v3874_v10 }
 0x29f   :  { %2769 = vmatprep.subr.mxu0 %v4426_v11  ;;  %2301 = vmatprep.mubr.f32.mxu1 %v3874_v10  ;;  %v2941_v11 = vsel %vm699_vm2, %v2932_v44, %v2934_v31 }
 0x2a1   :  { %v4554_v15 = vpop.permute.xlu0 %3152  ;;  %3840 = vmatmul.mubr.msk.f32.vlgmr.msra.gmra.mxu0 %vm1994_vm10, %v3839_v2  ;;  %v2363_v3 = vpop.permute.xlu1 %2362 }
 0x2a2   :  { %2770 = vmatpush1.msra.mxu0 %v4384_v9  ;;  %2803 = vmatprep.mubr.f32.mxu0 %v3874_v10  ;;  %v3155_v9 = vsel %vm483_vm4, %v3147_v46, %v4544_v63  ;;  %v2367_v17 = vsel %vm510_vm8, %v4514_v56, %v2363_v3 }
 0x2a3   :  { %2982 = vmatprep.subr.mxu0 %v2942_v39 }
 0x2a5   :  { %v2154_v5 = vpop.permute.xlu0 %2153  ;;  %3843 = vmatmul.mubr.msk.f32.vlgmr.msra.gmra.mxu0 %vm1994_vm10, %v3842_v55  ;;  %v3145_v14 = vpop.permute.xlu1 %3144 }
 0x2a6   :  { %2983 = vmatpush1.msra.mxu0 %v2941_v11  ;;  %v2158_v26 = vsel %vm298_vm6, %v4510_v47, %v2154_v5  ;;  %3016 = vmatprep.mubr.f32.mxu0 %v3874_v10  ;;  %v3154_v23 = vsel %vm483_vm4, %v3145_v14, %v3147_v46 }
 0x2a7   :  { %3195 = vmatprep.subr.mxu0 %v3155_v9  ;;  %2267 = vmatprep.subr.mxu1 %v2158_v26 }
 0x2a8   :  { %2268 = vmatpush1.msra.mxu1 %v2157_v19 }
 0x2a9   :  { %v3360_v51 = vpop.permute.xlu0 %3359  ;;  %3833 = vmatmul.mubr.msk.f32.vlgmr.msra.gmra.mxu1 %vm1994_vm10, %v1929_v52  ;;  %2476 = vmatprep.subr.mxu1 %v2367_v17  ;;  %v3362_v21 = vpop.permute.xlu1 %3361 }
 0x2aa   :  { %3847 = vmatmul.mubr.msk.f32.vlgmr.msra.gmra.mxu0 %vm1994_vm10, %v3846_v36  ;;  %2477 = vmatpush1.msra.mxu1 %v2366_v20  ;;  %v3368_v45 = vsel %vm97_vm1, %v3360_v51, %v3362_v21 }
 0x2ab   :  { %3196 = vmatpush1.msra.mxu0 %v3154_v23  ;;  %2510 = vmatprep.mubr.f32.mxu1 %v3874_v10 }
 0x2ac   :  { %3408 = vmatprep.subr.mxu0 %v3368_v45  ;;  %3229 = vmatprep.mubr.f32.mxu0 %v3874_v10 }
 0x2ad   :  { %v2576_v50 = vpop.permute.xlu0 %2575  ;;  %3837 = vmatmul.mubr.msk.f32.vlgmr.msra.gmra.mxu1 %vm1994_vm10, %v3835_v59  ;;  %v3366_v24 = vpop.permute.xlu1 %3365 }
 0x2ae   :  { %v2580_v16 = vsel %vm726_vm9, %v4512_v54, %v2576_v50  ;;  %2723 = vmatprep.mubr.f32.mxu1 %v3874_v10  ;;  %3851 = vmatmul.mubr.msk.f32.vlgmr.msra.gmra.mxu0 %vm1994_vm10, %v3850_v53 }
 0x2af   :  { %2689 = vmatprep.subr.mxu1 %v2580_v16  ;;  %3442 = vmatprep.mubr.f32.mxu0 %v3874_v10 }
 0x2b0   :  { %2690 = vmatpush1.msra.mxu1 %v2579_v37 }
 0x2b1   :  { %v3358_v22 = vpop.permute.xlu0 %3357  ;;  %3841 = vmatmul.mubr.msk.f32.vlgmr.msra.gmra.mxu1 %vm1994_vm10, %v3839_v2  ;;  %2840 = vmatprep.subr.mxu1 %v4441_v58  ;;  %v3151_v25 = vpop.permute.xlu1 %3150 }
 0x2b2   :  { %v3367_v28 = vsel %vm97_vm1, %v3358_v22, %v3360_v51  ;;  %2841 = vmatpush1.msra.mxu1 %v4393_v18  ;;  %2874 = vmatprep.mubr.f32.mxu1 %v3874_v10  ;;  %v3157_v18 = vsel %vm483_vm4, %v3151_v25, %v4554_v15  ;;  %v3156_v40 = vsel %vm483_vm4, %v4544_v63, %v3151_v25 }
 0x2b3   :  { %3409 = vmatpush1.msra.mxu0 %v3367_v28 }
 0x2b4   :  { %3855 = vmatmul.mubr.msk.f32.vlgmr.msra.gmra.mxu0 %vm1994_vm10, %v3854_v27 }
 0x2b5   :  { %v2938_v34 = vpop.permute.xlu0 %2937  ;;  %3844 = vmatmul.mubr.msk.f32.vlgmr.msra.gmra.mxu1 %vm1994_vm10, %v3842_v55  ;;  %v3573_v29 = vpop.permute.xlu1 %3572  ;;  %3655 = vmatprep.mubr.f32.mxu0 %v3874_v10 }
 0x2b6   :  { %v2943_v58 = vsel %vm699_vm2, %v4516_v60, %v2938_v34  ;;  %v2944_v35 = vsel %vm699_vm2, %v2938_v34, %v4508_v32  ;;  %3087 = vmatprep.mubr.f32.mxu1 %v3874_v10 }
 0x2b7   :  { %3053 = vmatprep.subr.mxu1 %v2944_v35 }
 0x2b8   :  { %3054 = vmatpush1.msra.mxu1 %v2943_v58 }
 0x2b9   :  { %v3575_v42 = vpop.permute.xlu0 %3574  ;;  %3848 = vmatmul.mubr.msk.f32.vlgmr.msra.gmra.mxu1 %vm1994_vm10, %v3846_v36  ;;  %3266 = vmatprep.subr.mxu1 %v3157_v18  ;;  %v3577_v43 = vpop.permute.xlu1 %3576 }
 0x2ba   :  { %3267 = vmatpush1.msra.mxu1 %v3156_v40  ;;  %v3581_v44 = vsel %vm58_vm0, %v3573_v29, %v3575_v42  ;;  %3300 = vmatprep.mubr.f32.mxu1 %v3874_v10  ;;  %v3582_v38 = vsel %vm58_vm0, %v3575_v42, %v3577_v43 }
 0x2bb   :  { %3621 = vmatprep.subr.mxu0 %v3581_v44 }
 0x2bd   :  { %v3364_v32 = vpop.permute.xlu0 %3363  ;;  %3852 = vmatmul.mubr.msk.f32.vlgmr.msra.gmra.mxu1 %vm1994_vm10, %v3850_v53  ;;  %v3571_v47 = vpop.permute.xlu1 %3570 }
 0x2be   :  { %v3369_v54 = vsel %vm97_vm1, %v3362_v21, %v3364_v32  ;;  %v3580_v56 = vsel %vm58_vm0, %v3571_v47, %v3573_v29  ;;  %v3370_v60 = vsel %vm97_vm1, %v3364_v32, %v3366_v24  ;;  %3513 = vmatprep.mubr.f32.mxu1 %v3874_v10 }
 0x2bf   :  { %3479 = vmatprep.subr.mxu1 %v3370_v60  ;;  %3622 = vmatpush1.msra.mxu0 %v3580_v56 }
 0x2c0   :  { %3480 = vmatpush1.msra.mxu1 %v3369_v54  ;;  %3859 = vmatmul.mubr.msk.f32.vlgmr.msra.gmra.mxu0 %vm1994_vm10, %v3858_v48 }
 0x2c1   :  { %v3579_v30 = vpop.permute.xlu0 %3578  ;;  %3856 = vmatmul.mubr.msk.f32.vlgmr.msra.gmra.mxu1 %vm1994_vm10, %v3854_v27 }
 0x2c2   :  { %v3583_v33 = vsel %vm58_vm0, %v3577_v43, %v3579_v30  ;;  %3726 = vmatprep.mubr.f32.mxu1 %v3874_v10 }
 0x2c3   :  { %3692 = vmatprep.subr.mxu1 %v3583_v33 }
 0x2c4   :  { %3693 = vmatpush1.msra.mxu1 %v3582_v38 }
 0x2c5   :  { %3860 = vmatmul.mubr.msk.f32.vlgmr.msra.gmra.mxu1 %vm1994_vm10, %v3858_v48 }
 0x2ce   :  { %v3741_v47 = vpop.permute.xlu0 %3740 }
 0x355   :  { %v2064_v61 = vpop.f32.mrf.mxu0 }
 0x357   :  { %v2066_v49 = vpop.f32.mrf.mxu0 }
 0x359   :  { %v2232_v0 = vpop.f32.mrf.mxu0 }
 0x35a   :  { %v2233_v57 = vadd.f32 %v2232_v0, %v2064_v61 }
 0x35b   :  { %v2234_v1 = vpop.f32.mrf.mxu0 }
 0x35c   :  { %v2235_v59 = vadd.f32 %v2234_v1, %v2066_v49 }
 0x35d   :  { %v2441_v4 = vpop.f32.mrf.mxu0  ;;  %v2135_v52 = vpop.f32.mrf.mxu1 }
 0x35e   :  { %v2517_v63 = vadd.f32 %v2441_v4, %v2233_v57 }
 0x35f   :  { %v2443_v41 = vpop.f32.mrf.mxu0  ;;  %v2137_v12 = vpop.f32.mrf.mxu1 }
 0x360   :  { %v2518_v2 = vadd.f32 %v2443_v41, %v2235_v59 }
 0x361   :  { %v2654_v7 = vpop.f32.mrf.mxu0 }
 0x362   :  { %v2730_v39 = vadd.f32 %v2654_v7, %v2517_v63 }
 0x363   :  { %v2656_v6 = vpop.f32.mrf.mxu0 }
 0x364   :  { %v2731_v11 = vadd.f32 %v2656_v6, %v2518_v2 }
 0x365   :  { %v2805_v31 = vpop.f32.mrf.mxu0 }
 0x366   :  { %v2881_v9 = vadd.f32 %v2805_v31, %v2730_v39 }
 0x367   :  { %v2807_v8 = vpop.f32.mrf.mxu0 }
 0x368   :  { %v2882_v19 = vadd.f32 %v2807_v8, %v2731_v11 }
 0x369   :  { %v2303_v10 = vpop.f32.mrf.mxu1 }
 0x36a   :  { %v3018_v62 = vpop.f32.mrf.mxu0  ;;  %v2304_v17 = vadd.f32 %v2303_v10, %v2135_v52 }
 0x36b   :  { %v2305_v13 = vpop.f32.mrf.mxu1  ;;  %v3094_v51 = vadd.f32 %v3018_v62, %v2881_v9 }
 0x36c   :  { %v3020_v3 = vpop.f32.mrf.mxu0  ;;  %v2306_v23 = vadd.f32 %v2305_v13, %v2137_v12 }
 0x36d   :  { %v2512_v46 = vpop.f32.mrf.mxu1  ;;  %v3095_v50 = vadd.f32 %v3020_v3, %v2882_v19 }
 0x36e   :  { %v3231_v14 = vpop.f32.mrf.mxu0  ;;  %v2519_v45 = vadd.f32 %v2512_v46, %v2304_v17 }
 0x36f   :  { %v2514_v15 = vpop.f32.mrf.mxu1  ;;  %v3307_v22 = vadd.f32 %v3231_v14, %v3094_v51 }
 0x370   :  { %v3233_v20 = vpop.f32.mrf.mxu0  ;;  %v2520_v16 = vadd.f32 %v2514_v15, %v2306_v23 }
 0x371   :  { %v2725_v55 = vpop.f32.mrf.mxu1  ;;  %v3308_v29 = vadd.f32 %v3233_v20, %v3095_v50 }
 0x372   :  { %v2732_v37 = vadd.f32 %v2725_v55, %v2519_v45 }
 0x373   :  { %v2727_v5 = vpop.f32.mrf.mxu1 }
 0x374   :  { %v3444_v53 = vpop.f32.mrf.mxu0  ;;  %v2733_v27 = vadd.f32 %v2727_v5, %v2520_v16 }
 0x375   :  { %v2876_v26 = vpop.f32.mrf.mxu1  ;;  %v3520_v58 = vadd.f32 %v3444_v53, %v3307_v22 }
 0x376   :  { %v2883_v28 = vadd.f32 %v2876_v26, %v2732_v37  ;;  %v3446_v34 = vpop.f32.mrf.mxu0 }
 0x377   :  { %v2878_v36 = vpop.f32.mrf.mxu1  ;;  %v3521_v43 = vadd.f32 %v3446_v34, %v3308_v29 }
 0x378   :  { %v2884_v18 = vadd.f32 %v2878_v36, %v2733_v27 }
 0x379   :  { %v3089_v21 = vpop.f32.mrf.mxu1 }
 0x37a   :  { %v3096_v40 = vadd.f32 %v3089_v21, %v2883_v28 }
 0x37b   :  { %v3091_v24 = vpop.f32.mrf.mxu1 }
 0x37c   :  { %v3097_v48 = vadd.f32 %v3091_v24, %v2884_v18 }
 0x37d   :  { %v3302_v25 = vpop.f32.mrf.mxu1 }
 0x37e   :  { %v3309_v54 = vadd.f32 %v3302_v25, %v3096_v40 }
 0x37f   :  { %v3304_v35 = vpop.f32.mrf.mxu1 }
 0x380   :  { %v3657_v42 = vpop.f32.mrf.mxu0  ;;  %v3310_v38 = vadd.f32 %v3304_v35, %v3097_v48 }
 0x381   :  { %v3733_v44 = vadd.f32 %v3657_v42, %v3520_v58  ;;  %v3515_v32 = vpop.f32.mrf.mxu1 }
 0x382   :  { %v3659_v56 = vpop.f32.mrf.mxu0  ;;  %v3522_v61 = vadd.f32 %v3515_v32, %v3309_v54 }
 0x383   :  { %v3743_v60 = vadd.f32 %v3741_v47, %v3733_v44  ;;  %v3734_v30 = vadd.f32 %v3659_v56, %v3521_v43  ;;  %v3517_v33 = vpop.f32.mrf.mxu1 }
 0x384   :  { %v3523_v4 = vadd.f32 %v3517_v33, %v3310_v38 }
 0x385   :  { %v3747_v49 = vmax.f32 %v3743_v60, 0.0  ;;  %v3744_v0 = vadd.f32 %v3741_v47, %v3734_v30  ;;  %v3728_v1 = vpop.f32.mrf.mxu1 }
 0x386   :  { %v3735_v41 = vadd.f32 %v3728_v1, %v3522_v61 }
 0x387   :  { %3751 = vst [vmem:[%s4653_s6] sm:$0xff] %v3747_v49  ;;  %v3748_v7 = vmax.f32 %v3744_v0, 0.0  ;;  %v3730_v52 = vpop.f32.mrf.mxu1 }
 0x388   :  { %v3745_v6 = vadd.f32 %v3741_v47, %v3735_v41  ;;  %v3736_v31 = vadd.f32 %v3730_v52, %v3523_v4 }
 0x389   :  { %3752 = vst [vmem:[%s4653_s6 + $0x8] sm:$0xff] %v3748_v7 }
 0x38a   :  { %v3749_v12 = vmax.f32 %v3745_v6, 0.0  ;;  %v3746_v8 = vadd.f32 %v3741_v47, %v3736_v31 }
 0x38c   :  { %3753 = vst [vmem:[%s4653_s6 + $0x10] sm:$0xff] %v3749_v12  ;;  %v3750_v57 = vmax.f32 %v3746_v8, 0.0 }
 0x38e   :  { %3754 = vst [vmem:[%s4653_s6 + $0x18] sm:$0xff] %v3750_v57 }

</bundles_post_ra>
